<compile_context>
chip_gen: v6e
topology: v6e:2x2x1
jax: 0.10.0
libtpu: 0.0.40
codegen_flags: <defaults>
</compile_context>

<pallas_src>
import math

import jax
import jax.numpy as jnp
from jax import lax
from jax.experimental import pallas as pl
from jax.experimental.pallas import tpu as pltpu


# ---------------------------------------------------------------- helpers ----
def _chunk_bounds(c, n):
    """Mimic torch.chunk boundaries: list of (start, size)."""
    size = -(-c // n)  # ceil
    bounds, start = [], 0
    while start < c:
        sz = min(size, c - start)
        bounds.append((start, sz))
        start += sz
    return bounds


# ----------------------------------------------------------------- kernel ----
def _make_kernel(H, W, C, Ch, Co, shift_size, pad, Bs, approx_gelu=True):
    HW = H * W
    N = Bs * HW
    in_bounds = _chunk_bounds(C, shift_size)
    hid_bounds = _chunk_bounds(Ch, shift_size)
    shifts = list(range(-pad, pad + 1))

    def _roll(v, amt):
        """Roll along the flat pixel (lane) axis; static, normalised to >= 0."""
        amt = amt % N
        if amt == 0:
            return v
        return pltpu.roll(v, amt, axis=1)

    def kernel(x_ref, w1_ref, dww_ref, dwb_ref, w2_ref, o_ref):
        f32 = jnp.float32
        zero = f32(0.0)
        x = x_ref[...]                                       # (C, N)

        # ---- hoisted per-lane coordinates & boundary masks -------------------
        lane = lax.broadcasted_iota(jnp.int32, (1, N), 1)
        pix = lane % HW                  # pixel index inside its own image
        w_lane = lane % W                # column index inside its own row
        # dwconv (3x3, padding=1) validity masks
        m_top = pix >= W                 # h >= 1
        m_bot = pix < (H - 1) * W        # h <= H-2
        m_left = w_lane >= 1
        m_right = w_lane <= W - 2

        def h_valid(s):                  # shift-along-H validity (None == all)
            if s > 0:
                return pix >= s * W
            if s < 0:
                return pix < (H + s) * W
            return None

        def w_valid(s):                  # shift-along-W validity
            if s > 0:
                return w_lane >= s
            if s < 0:
                return w_lane < W + s
            return None

        # ---- shift #1: per input-channel chunk, shift along H ----------------
        # Roll the whole slab by s*W lanes; rows that would wrap (within or
        # across the images packed on the N axis) are masked off, and a
        # per-sublane iota mask picks which channels take which shift.
        c_iota = lax.broadcasted_iota(jnp.int32, (C, 1), 0)
        xs = jnp.zeros((C, N), f32)
        for (start, sz), s in zip(in_bounds, shifts):
            sel = (c_iota >= start) & (c_iota < start + sz)   # (C, 1)
            hv = h_valid(s)
            m = sel if hv is None else (sel & hv)
            xs = jnp.where(m, _roll(x, s * W), xs)

        # ---- fc1 : (Ch, C) @ (C, N) on the MXU --------------------------------
        h = jnp.dot(w1_ref[...], xs, preferred_element_type=f32)    # (Ch, N)

        # ---- depthwise 3x3 conv (padding=1) + bias ----------------------------
        dww = dww_ref[...]                                   # (Ch, 9)
        tap_w = [dww[:, k:k + 1] for k in range(9)]          # hoisted weights
        tap_m = []                                           # hoisted masks
        for ky in range(3):
            for kx in range(3):
                dy, dx = ky - 1, kx - 1
                m = None
                if dy == -1:
                    m = m_top
                elif dy == 1:
                    m = m_bot
                if dx == -1:
                    m = m_left if m is None else (m & m_left)
                elif dx == 1:
                    m = m_right if m is None else (m & m_right)
                tap_m.append(m)

        acc = jnp.broadcast_to(dwb_ref[...], (Ch, N))        # bias as init
        for k in range(9):
            dy, dx = k // 3 - 1, k % 3 - 1
            tap = _roll(h, -(dy * W + dx))                   # tap[p] = h[p+dy*W+dx]
            if tap_m[k] is not None:
                tap = jnp.where(tap_m[k], tap, zero)
            acc = acc + tap * tap_w[k]

        # ---- GELU (tanh form -> EUP slot; exact erf available via flag) -------
        a = jax.nn.gelu(acc, approximate=approx_gelu)

        # ---- shift #2: per hidden-channel chunk, shift along W ----------------
        ch_iota = lax.broadcasted_iota(jnp.int32, (Ch, 1), 0)
        a_s = jnp.zeros((Ch, N), f32)
        for (start, sz), s in zip(hid_bounds, shifts):
            sel = (ch_iota >= start) & (ch_iota < start + sz)
            wv = w_valid(s)
            m = sel if wv is None else (sel & wv)
            a_s = jnp.where(m, _roll(a, s), a_s)

        # ---- fc2 : (Co, Ch) @ (Ch, N) -> lane-dense output slab ---------------
        out = jnp.dot(w2_ref[...], a_s, preferred_element_type=f32)
        o_ref[...] = out.astype(o_ref.dtype)

    return kernel


# ---------------------------------------------------------------- wrapper ----
def shiftmlp_forward(x_nchw, params, shift_size=5, approx_gelu=True):
    w1, dww, dwb, w2 = params["w1"], params["dw_w"], params["dw_b"], params["w2"]
    B, C, H, W = x_nchw.shape
    Ch = w1.shape[0]
    Co = w2.shape[0]
    pad = shift_size // 2
    HW = H * W

    # <=2 grid steps: amortizes per-step overhead while still giving v7x's two
    # TensorCores independent work ("parallel" axis). Each step sees one
    # channel-major, lane-dense (C, Bs*HW) slab.
    grid_n = 2 if (B >= 2 and B % 2 == 0) else 1
    Bs = B // grid_n

    # NCHW -> channel-major (C, B*HW). Tiny HBM-side XLA transpose; inside the
    # kernel everything is lane-dense with zero relayouts.
    x2 = jnp.transpose(x_nchw.reshape(B, C, HW), (1, 0, 2)).reshape(C, B * HW)

    kernel = _make_kernel(H, W, C, Ch, Co, shift_size, pad, Bs, approx_gelu)

    # TODO(synk): for production UNeXt shapes add an H-tiled grid axis with a
    # (pad+1)-row halo so the per-step slab stays under v7x's 64 MiB VMEM.
    out = pl.pallas_call(
        kernel,
        out_shape=jax.ShapeDtypeStruct((Co, B * HW), x_nchw.dtype),
        grid_spec=pltpu.PrefetchScalarGridSpec(
            num_scalar_prefetch=0,
            grid=(grid_n,),
            in_specs=[
                pl.BlockSpec((C, Bs * HW), lambda g: (0, g)),
                pl.BlockSpec((Ch, C), lambda g: (0, 0)),
                pl.BlockSpec((Ch, 9), lambda g: (0, 0)),
                pl.BlockSpec((Ch, 1), lambda g: (0, 0)),
                pl.BlockSpec((Co, Ch), lambda g: (0, 0)),
            ],
            out_specs=pl.BlockSpec((Co, Bs * HW), lambda g: (0, g)),
        ),
        compiler_params=pltpu.CompilerParams(
            dimension_semantics=("parallel",),      # both TCs on v7x get a step
            vmem_limit_bytes=32 * 1024 * 1024),
    )(x2, w1, dww, dwb, w2)

    return jnp.transpose(out.reshape(Co, B, HW), (1, 0, 2)).reshape(B, Co, H, W)


# ------------------------------------------------------------- params init ---
def init_params(key, in_features, hidden_features, out_features):
    """Deterministic init mirroring the module's _init_weights for Conv2d."""
    k1, k2, k3 = jax.random.split(key, 3)
    # fc1: Conv2d(in, hidden, 1, bias=False): fan_out = 1*1*hidden
    w1_t = jax.random.normal(k1, (hidden_features, in_features), jnp.float32) \
        * math.sqrt(2.0 / hidden_features)                       # torch (O, I)
    # dwconv: Conv2d(hidden, hidden, 3, groups=hidden): fan_out = 9
    dw_t = jax.random.normal(k2, (hidden_features, 1, 3, 3), jnp.float32) \
        * math.sqrt(2.0 / 9.0)                                   # torch (O, 1, 3, 3)
    dw_b = jnp.zeros((hidden_features,), jnp.float32)
    # fc2: Conv2d(hidden, out, 1, bias=False): fan_out = out
    w2_t = jax.random.normal(k3, (out_features, hidden_features), jnp.float32) \
        * math.sqrt(2.0 / out_features)                          # torch (O, I)

    kernel_params = {
        "w1": w1_t,                                        # (hidden, in)  == (O, I)
        "dw_w": dw_t[:, 0].reshape(hidden_features, 9),    # (hidden, 9), k = ky*3+kx
        "dw_b": dw_b.reshape(hidden_features, 1),          # (hidden, 1)
        "w2": w2_t,                                        # (out, hidden) == (O, I)
    }
    torch_params = {"w1": w1_t, "dw_w": dw_t, "dw_b": dw_b, "w2": w2_t}
    return kernel_params, torch_params


# ------------------------------------------------------ plain-JAX reference --
def ref_forward(x, tp, shift_size=5):
    B, C, H, W = x.shape
    pad = shift_size // 2
    shifts = list(range(-pad, pad + 1))
    hp = jax.lax.Precision.HIGHEST

    def shift_block(z, axis):
        zn = jnp.pad(z, ((0, 0), (0, 0), (pad, pad), (pad, pad)))
        bounds = _chunk_bounds(z.shape[1], shift_size)
        pieces = [jnp.roll(zn[:, st:st + sz], s, axis=axis)
                  for (st, sz), s in zip(bounds, shifts)]
        cat = jnp.concatenate(pieces, axis=1)
        return cat[:, :, pad:pad + H, pad:pad + W]

    xs = shift_block(x, 2)
    h = jnp.einsum("bchw,oc->bohw", xs, tp["w1"], precision=hp)
    h = lax.conv_general_dilated(
        h, tp["dw_w"], window_strides=(1, 1), padding=((1, 1), (1, 1)),
        feature_group_count=tp["dw_w"].shape[0],
        dimension_numbers=("NCHW", "OIHW", "NCHW"), precision=hp)
    h = h + tp["dw_b"][None, :, None, None]
    h = jax.nn.gelu(h, approximate=False)        # nn.GELU default (exact erf)
    hs = shift_block(h, 3)
    return jnp.einsum("bchw,oc->bohw", hs, tp["w2"], precision=hp)


# -------------------------------------------------------------------- main ---
if __name__ == "__main__":
    key = jax.random.PRNGKey(0)
    kx, kp = jax.random.split(key)

    B, C, H, W = 2, 10, 16, 16          # in_features = 10
    hidden, out_f = 20, 10              # hidden_features = 20, out_features = in

    x = jax.random.normal(kx, (B, C, H, W), jnp.float32)
    params, tparams = init_params(kp, C, hidden, out_f)

    fwd = jax.jit(lambda inp: shiftmlp_forward(inp, params))
    y = jax.block_until_ready(fwd(x))
    assert y.shape == (B, out_f, H, W)

    y_ref = ref_forward(x, tparams)
    if not jnp.allclose(y, y_ref, rtol=3e-2, atol=3e-2):
        raise AssertionError(
            f"mismatch vs reference, max abs err = {jnp.max(jnp.abs(y - y_ref))}")

    print("KERNEL_OK")
</pallas_src>

<mosaic_0001>
module attributes {stable_mosaic.version = 11 : i64} {
  func.func @kernel(%arg0: i32, %arg1: memref<10x256xf32, #tpu.memory_space<vmem>>, %arg2: memref<20x10xf32, #tpu.memory_space<vmem>>, %arg3: memref<20x9xf32, #tpu.memory_space<vmem>>, %arg4: memref<20x1xf32, #tpu.memory_space<vmem>>, %arg5: memref<10x20xf32, #tpu.memory_space<vmem>>, %arg6: memref<10x256xf32, #tpu.memory_space<vmem>>) attributes {dimension_semantics = [#tpu.dimension_semantics<parallel>], iteration_bounds = array<i64: 2>, scalar_prefetch = 0 : i64, scratch_operands = 0 : i64, tpu.core_type = #tpu.core_type<tc>, window_params = [{transform_indices = @transform_0, window_bounds = array<i64: 10, 256>}, {pipeline_mode = #tpu.pipeline_mode<synchronous>, transform_indices = @transform_1, window_bounds = array<i64: 20, 10>}, {pipeline_mode = #tpu.pipeline_mode<synchronous>, transform_indices = @transform_2, window_bounds = array<i64: 20, 9>}, {pipeline_mode = #tpu.pipeline_mode<synchronous>, transform_indices = @transform_3, window_bounds = array<i64: 20, 1>}, {pipeline_mode = #tpu.pipeline_mode<synchronous>, transform_indices = @transform_4, window_bounds = array<i64: 10, 20>}, {transform_indices = @transform_5, window_bounds = array<i64: 10, 256>}]} {
    %c0 = arith.constant 0 : index
    %c0_0 = arith.constant 0 : index
    %0 = vector.load %arg1[%c0, %c0_0] : memref<10x256xf32, #tpu.memory_space<vmem>>, vector<10x256xf32>
    %1 = tpu.iota {dimensions = array<i32: 1>} : vector<1x256xi32>
    %c256_i32 = arith.constant 256 : i32
    %c0_i32 = arith.constant 0 : i32
    %2 = arith.cmpi eq, %c256_i32, %c0_i32 : i32
    %c1_i32 = arith.constant 1 : i32
    %3 = arith.select %2, %c1_i32, %c256_i32 : i32
    %4 = vector.broadcast %3 : i32 to vector<1x256xi32>
    %5 = arith.remsi %1, %4 : vector<1x256xi32>
    %c0_i32_1 = arith.constant 0 : i32
    %6 = vector.broadcast %c0_i32_1 : i32 to vector<1x256xi32>
    %7 = arith.cmpi ne, %5, %6 : vector<1x256xi32>
    %c0_i32_2 = arith.constant 0 : i32
    %8 = vector.broadcast %c0_i32_2 : i32 to vector<1x256xi32>
    %9 = arith.cmpi slt, %5, %8 : vector<1x256xi32>
    %c0_i32_3 = arith.constant 0 : i32
    %10 = arith.cmpi slt, %3, %c0_i32_3 : i32
    %11 = vector.broadcast %10 : i1 to vector<1x256xi1>
    %12 = vector.broadcast %11 : vector<1x256xi1> to vector<1x256xi1>
    %13 = arith.xori %9, %12 : vector<1x256xi1>
    %14 = arith.andi %13, %7 : vector<1x256xi1>
    %15 = vector.broadcast %3 : i32 to vector<1x256xi32>
    %16 = arith.addi %5, %15 : vector<1x256xi32>
    %17 = arith.select %14, %16, %5 : vector<1x256xi1>, vector<1x256xi32>
    %c16_i32 = arith.constant 16 : i32
    %c0_i32_4 = arith.constant 0 : i32
    %18 = arith.cmpi eq, %c16_i32, %c0_i32_4 : i32
    %c1_i32_5 = arith.constant 1 : i32
    %19 = arith.select %18, %c1_i32_5, %c16_i32 : i32
    %20 = vector.broadcast %19 : i32 to vector<1x256xi32>
    %21 = arith.remsi %1, %20 : vector<1x256xi32>
    %c0_i32_6 = arith.constant 0 : i32
    %22 = vector.broadcast %c0_i32_6 : i32 to vector<1x256xi32>
    %23 = arith.cmpi ne, %21, %22 : vector<1x256xi32>
    %c0_i32_7 = arith.constant 0 : i32
    %24 = vector.broadcast %c0_i32_7 : i32 to vector<1x256xi32>
    %25 = arith.cmpi slt, %21, %24 : vector<1x256xi32>
    %c0_i32_8 = arith.constant 0 : i32
    %26 = arith.cmpi slt, %19, %c0_i32_8 : i32
    %27 = vector.broadcast %26 : i1 to vector<1x256xi1>
    %28 = vector.broadcast %27 : vector<1x256xi1> to vector<1x256xi1>
    %29 = arith.xori %25, %28 : vector<1x256xi1>
    %30 = arith.andi %29, %23 : vector<1x256xi1>
    %31 = vector.broadcast %19 : i32 to vector<1x256xi32>
    %32 = arith.addi %21, %31 : vector<1x256xi32>
    %33 = arith.select %30, %32, %21 : vector<1x256xi1>, vector<1x256xi32>
    %c16_i32_9 = arith.constant 16 : i32
    %34 = vector.broadcast %c16_i32_9 : i32 to vector<1x256xi32>
    %35 = arith.cmpi sge, %17, %34 : vector<1x256xi32>
    %c240_i32 = arith.constant 240 : i32
    %36 = vector.broadcast %c240_i32 : i32 to vector<1x256xi32>
    %37 = arith.cmpi slt, %17, %36 : vector<1x256xi32>
    %c1_i32_10 = arith.constant 1 : i32
    %38 = vector.broadcast %c1_i32_10 : i32 to vector<1x256xi32>
    %39 = arith.cmpi sge, %33, %38 : vector<1x256xi32>
    %c14_i32 = arith.constant 14 : i32
    %40 = vector.broadcast %c14_i32 : i32 to vector<1x256xi32>
    %41 = arith.cmpi sle, %33, %40 : vector<1x256xi32>
    %42 = tpu.iota {dimensions = array<i32: 0>} : vector<10x1xi32>
    %cst = arith.constant 0.000000e+00 : f32
    %43 = vector.broadcast %cst : f32 to vector<10x256xf32>
    %c0_i32_11 = arith.constant 0 : i32
    %44 = vector.broadcast %c0_i32_11 : i32 to vector<10x1xi32>
    %45 = arith.cmpi sge, %42, %44 : vector<10x1xi32>
    %c2_i32 = arith.constant 2 : i32
    %46 = vector.broadcast %c2_i32 : i32 to vector<10x1xi32>
    %47 = arith.cmpi slt, %42, %46 : vector<10x1xi32>
    %48 = arith.andi %45, %47 : vector<10x1xi1>
    %c224_i32 = arith.constant 224 : i32
    %49 = vector.broadcast %c224_i32 : i32 to vector<1x256xi32>
    %50 = arith.cmpi slt, %17, %49 : vector<1x256xi32>
    %51 = vector.broadcast %48 : vector<10x1xi1> to vector<10x256xi1>
    %52 = vector.broadcast %50 : vector<1x256xi1> to vector<10x256xi1>
    %53 = arith.andi %51, %52 : vector<10x256xi1>
    %c224_i32_12 = arith.constant 224 : i32
    %54 = tpu.dynamic_rotate %0 by %c224_i32_12 dim 1 : vector<10x256xf32>, i32 -> vector<10x256xf32>
    %55 = arith.select %53, %54, %43 : vector<10x256xi1>, vector<10x256xf32>
    %c2_i32_13 = arith.constant 2 : i32
    %56 = vector.broadcast %c2_i32_13 : i32 to vector<10x1xi32>
    %57 = arith.cmpi sge, %42, %56 : vector<10x1xi32>
    %c4_i32 = arith.constant 4 : i32
    %58 = vector.broadcast %c4_i32 : i32 to vector<10x1xi32>
    %59 = arith.cmpi slt, %42, %58 : vector<10x1xi32>
    %60 = arith.andi %57, %59 : vector<10x1xi1>
    %c240_i32_14 = arith.constant 240 : i32
    %61 = vector.broadcast %c240_i32_14 : i32 to vector<1x256xi32>
    %62 = arith.cmpi slt, %17, %61 : vector<1x256xi32>
    %63 = vector.broadcast %60 : vector<10x1xi1> to vector<10x256xi1>
    %64 = vector.broadcast %62 : vector<1x256xi1> to vector<10x256xi1>
    %65 = arith.andi %63, %64 : vector<10x256xi1>
    %c240_i32_15 = arith.constant 240 : i32
    %66 = tpu.dynamic_rotate %0 by %c240_i32_15 dim 1 : vector<10x256xf32>, i32 -> vector<10x256xf32>
    %67 = arith.select %65, %66, %55 : vector<10x256xi1>, vector<10x256xf32>
    %c4_i32_16 = arith.constant 4 : i32
    %68 = vector.broadcast %c4_i32_16 : i32 to vector<10x1xi32>
    %69 = arith.cmpi sge, %42, %68 : vector<10x1xi32>
    %c6_i32 = arith.constant 6 : i32
    %70 = vector.broadcast %c6_i32 : i32 to vector<10x1xi32>
    %71 = arith.cmpi slt, %42, %70 : vector<10x1xi32>
    %72 = arith.andi %69, %71 : vector<10x1xi1>
    %73 = vector.shape_cast %72 : vector<10x1xi1> to vector<10x1xi1>
    %74 = vector.broadcast %73 : vector<10x1xi1> to vector<10x256xi1>
    %75 = arith.select %74, %0, %67 : vector<10x256xi1>, vector<10x256xf32>
    %c6_i32_17 = arith.constant 6 : i32
    %76 = vector.broadcast %c6_i32_17 : i32 to vector<10x1xi32>
    %77 = arith.cmpi sge, %42, %76 : vector<10x1xi32>
    %c8_i32 = arith.constant 8 : i32
    %78 = vector.broadcast %c8_i32 : i32 to vector<10x1xi32>
    %79 = arith.cmpi slt, %42, %78 : vector<10x1xi32>
    %80 = arith.andi %77, %79 : vector<10x1xi1>
    %c16_i32_18 = arith.constant 16 : i32
    %81 = vector.broadcast %c16_i32_18 : i32 to vector<1x256xi32>
    %82 = arith.cmpi sge, %17, %81 : vector<1x256xi32>
    %83 = vector.broadcast %80 : vector<10x1xi1> to vector<10x256xi1>
    %84 = vector.broadcast %82 : vector<1x256xi1> to vector<10x256xi1>
    %85 = arith.andi %83, %84 : vector<10x256xi1>
    %c16_i32_19 = arith.constant 16 : i32
    %86 = tpu.dynamic_rotate %0 by %c16_i32_19 dim 1 : vector<10x256xf32>, i32 -> vector<10x256xf32>
    %87 = arith.select %85, %86, %75 : vector<10x256xi1>, vector<10x256xf32>
    %c8_i32_20 = arith.constant 8 : i32
    %88 = vector.broadcast %c8_i32_20 : i32 to vector<10x1xi32>
    %89 = arith.cmpi sge, %42, %88 : vector<10x1xi32>
    %c10_i32 = arith.constant 10 : i32
    %90 = vector.broadcast %c10_i32 : i32 to vector<10x1xi32>
    %91 = arith.cmpi slt, %42, %90 : vector<10x1xi32>
    %92 = arith.andi %89, %91 : vector<10x1xi1>
    %c32_i32 = arith.constant 32 : i32
    %93 = vector.broadcast %c32_i32 : i32 to vector<1x256xi32>
    %94 = arith.cmpi sge, %17, %93 : vector<1x256xi32>
    %95 = vector.broadcast %92 : vector<10x1xi1> to vector<10x256xi1>
    %96 = vector.broadcast %94 : vector<1x256xi1> to vector<10x256xi1>
    %97 = arith.andi %95, %96 : vector<10x256xi1>
    %c32_i32_21 = arith.constant 32 : i32
    %98 = tpu.dynamic_rotate %0 by %c32_i32_21 dim 1 : vector<10x256xf32>, i32 -> vector<10x256xf32>
    %99 = arith.select %97, %98, %87 : vector<10x256xi1>, vector<10x256xf32>
    %c0_22 = arith.constant 0 : index
    %c0_23 = arith.constant 0 : index
    %100 = vector.load %arg2[%c0_22, %c0_23] : memref<20x10xf32, #tpu.memory_space<vmem>>, vector<20x10xf32>
    %cst_24 = arith.constant dense<0.000000e+00> : vector<20x256xf32>
    %101 = tpu.matmul %100, %99, %cst_24 {dimension_numbers = #tpu.dot_dimension_numbers<[1], [0], [0], [1], [0, 0, 1, 1], [], []>} : vector<20x10xf32>, vector<10x256xf32>, vector<20x256xf32> -> vector<20x256xf32>
    %c0_25 = arith.constant 0 : index
    %c0_26 = arith.constant 0 : index
    %102 = vector.load %arg3[%c0_25, %c0_26] : memref<20x9xf32, #tpu.memory_space<vmem>>, vector<20x9xf32>
    %103 = vector.extract_strided_slice %102 {offsets = [0, 0], sizes = [20, 1], strides = [1, 1]} : vector<20x9xf32> to vector<20x1xf32>
    %104 = vector.extract_strided_slice %102 {offsets = [0, 1], sizes = [20, 1], strides = [1, 1]} : vector<20x9xf32> to vector<20x1xf32>
    %105 = vector.extract_strided_slice %102 {offsets = [0, 2], sizes = [20, 1], strides = [1, 1]} : vector<20x9xf32> to vector<20x1xf32>
    %106 = vector.extract_strided_slice %102 {offsets = [0, 3], sizes = [20, 1], strides = [1, 1]} : vector<20x9xf32> to vector<20x1xf32>
    %107 = vector.extract_strided_slice %102 {offsets = [0, 4], sizes = [20, 1], strides = [1, 1]} : vector<20x9xf32> to vector<20x1xf32>
    %108 = vector.extract_strided_slice %102 {offsets = [0, 5], sizes = [20, 1], strides = [1, 1]} : vector<20x9xf32> to vector<20x1xf32>
    %109 = vector.extract_strided_slice %102 {offsets = [0, 6], sizes = [20, 1], strides = [1, 1]} : vector<20x9xf32> to vector<20x1xf32>
    %110 = vector.extract_strided_slice %102 {offsets = [0, 7], sizes = [20, 1], strides = [1, 1]} : vector<20x9xf32> to vector<20x1xf32>
    %111 = vector.extract_strided_slice %102 {offsets = [0, 8], sizes = [20, 1], strides = [1, 1]} : vector<20x9xf32> to vector<20x1xf32>
    %112 = arith.andi %35, %39 : vector<1x256xi1>
    %113 = arith.andi %35, %41 : vector<1x256xi1>
    %114 = arith.andi %37, %39 : vector<1x256xi1>
    %115 = arith.andi %37, %41 : vector<1x256xi1>
    %c0_27 = arith.constant 0 : index
    %c0_28 = arith.constant 0 : index
    %116 = vector.load %arg4[%c0_27, %c0_28] : memref<20x1xf32, #tpu.memory_space<vmem>>, vector<20x1xf32>
    %117 = vector.shape_cast %116 : vector<20x1xf32> to vector<20x1xf32>
    %118 = vector.broadcast %117 : vector<20x1xf32> to vector<20x256xf32>
    %c17_i32 = arith.constant 17 : i32
    %119 = tpu.dynamic_rotate %101 by %c17_i32 dim 1 : vector<20x256xf32>, i32 -> vector<20x256xf32>
    %cst_29 = arith.constant 0.000000e+00 : f32
    %120 = vector.shape_cast %112 : vector<1x256xi1> to vector<1x256xi1>
    %121 = vector.broadcast %120 : vector<1x256xi1> to vector<20x256xi1>
    %122 = vector.broadcast %cst_29 : f32 to vector<20x256xf32>
    %123 = arith.select %121, %119, %122 : vector<20x256xi1>, vector<20x256xf32>
    %124 = vector.broadcast %103 : vector<20x1xf32> to vector<20x256xf32>
    %125 = arith.mulf %123, %124 : vector<20x256xf32>
    %126 = arith.addf %118, %125 : vector<20x256xf32>
    %c16_i32_30 = arith.constant 16 : i32
    %127 = tpu.dynamic_rotate %101 by %c16_i32_30 dim 1 : vector<20x256xf32>, i32 -> vector<20x256xf32>
    %cst_31 = arith.constant 0.000000e+00 : f32
    %128 = vector.shape_cast %35 : vector<1x256xi1> to vector<1x256xi1>
    %129 = vector.broadcast %128 : vector<1x256xi1> to vector<20x256xi1>
    %130 = vector.broadcast %cst_31 : f32 to vector<20x256xf32>
    %131 = arith.select %129, %127, %130 : vector<20x256xi1>, vector<20x256xf32>
    %132 = vector.broadcast %104 : vector<20x1xf32> to vector<20x256xf32>
    %133 = arith.mulf %131, %132 : vector<20x256xf32>
    %134 = arith.addf %126, %133 : vector<20x256xf32>
    %c15_i32 = arith.constant 15 : i32
    %135 = tpu.dynamic_rotate %101 by %c15_i32 dim 1 : vector<20x256xf32>, i32 -> vector<20x256xf32>
    %cst_32 = arith.constant 0.000000e+00 : f32
    %136 = vector.shape_cast %113 : vector<1x256xi1> to vector<1x256xi1>
    %137 = vector.broadcast %136 : vector<1x256xi1> to vector<20x256xi1>
    %138 = vector.broadcast %cst_32 : f32 to vector<20x256xf32>
    %139 = arith.select %137, %135, %138 : vector<20x256xi1>, vector<20x256xf32>
    %140 = vector.broadcast %105 : vector<20x1xf32> to vector<20x256xf32>
    %141 = arith.mulf %139, %140 : vector<20x256xf32>
    %142 = arith.addf %134, %141 : vector<20x256xf32>
    %c1_i32_33 = arith.constant 1 : i32
    %143 = tpu.dynamic_rotate %101 by %c1_i32_33 dim 1 : vector<20x256xf32>, i32 -> vector<20x256xf32>
    %cst_34 = arith.constant 0.000000e+00 : f32
    %144 = vector.shape_cast %39 : vector<1x256xi1> to vector<1x256xi1>
    %145 = vector.broadcast %144 : vector<1x256xi1> to vector<20x256xi1>
    %146 = vector.broadcast %cst_34 : f32 to vector<20x256xf32>
    %147 = arith.select %145, %143, %146 : vector<20x256xi1>, vector<20x256xf32>
    %148 = vector.broadcast %106 : vector<20x1xf32> to vector<20x256xf32>
    %149 = arith.mulf %147, %148 : vector<20x256xf32>
    %150 = arith.addf %142, %149 : vector<20x256xf32>
    %151 = vector.broadcast %107 : vector<20x1xf32> to vector<20x256xf32>
    %152 = arith.mulf %101, %151 : vector<20x256xf32>
    %153 = arith.addf %150, %152 : vector<20x256xf32>
    %c255_i32 = arith.constant 255 : i32
    %154 = tpu.dynamic_rotate %101 by %c255_i32 dim 1 : vector<20x256xf32>, i32 -> vector<20x256xf32>
    %cst_35 = arith.constant 0.000000e+00 : f32
    %155 = vector.shape_cast %41 : vector<1x256xi1> to vector<1x256xi1>
    %156 = vector.broadcast %155 : vector<1x256xi1> to vector<20x256xi1>
    %157 = vector.broadcast %cst_35 : f32 to vector<20x256xf32>
    %158 = arith.select %156, %154, %157 : vector<20x256xi1>, vector<20x256xf32>
    %159 = vector.broadcast %108 : vector<20x1xf32> to vector<20x256xf32>
    %160 = arith.mulf %158, %159 : vector<20x256xf32>
    %161 = arith.addf %153, %160 : vector<20x256xf32>
    %c241_i32 = arith.constant 241 : i32
    %162 = tpu.dynamic_rotate %101 by %c241_i32 dim 1 : vector<20x256xf32>, i32 -> vector<20x256xf32>
    %cst_36 = arith.constant 0.000000e+00 : f32
    %163 = vector.shape_cast %114 : vector<1x256xi1> to vector<1x256xi1>
    %164 = vector.broadcast %163 : vector<1x256xi1> to vector<20x256xi1>
    %165 = vector.broadcast %cst_36 : f32 to vector<20x256xf32>
    %166 = arith.select %164, %162, %165 : vector<20x256xi1>, vector<20x256xf32>
    %167 = vector.broadcast %109 : vector<20x1xf32> to vector<20x256xf32>
    %168 = arith.mulf %166, %167 : vector<20x256xf32>
    %169 = arith.addf %161, %168 : vector<20x256xf32>
    %c240_i32_37 = arith.constant 240 : i32
    %170 = tpu.dynamic_rotate %101 by %c240_i32_37 dim 1 : vector<20x256xf32>, i32 -> vector<20x256xf32>
    %cst_38 = arith.constant 0.000000e+00 : f32
    %171 = vector.shape_cast %37 : vector<1x256xi1> to vector<1x256xi1>
    %172 = vector.broadcast %171 : vector<1x256xi1> to vector<20x256xi1>
    %173 = vector.broadcast %cst_38 : f32 to vector<20x256xf32>
    %174 = arith.select %172, %170, %173 : vector<20x256xi1>, vector<20x256xf32>
    %175 = vector.broadcast %110 : vector<20x1xf32> to vector<20x256xf32>
    %176 = arith.mulf %174, %175 : vector<20x256xf32>
    %177 = arith.addf %169, %176 : vector<20x256xf32>
    %c239_i32 = arith.constant 239 : i32
    %178 = tpu.dynamic_rotate %101 by %c239_i32 dim 1 : vector<20x256xf32>, i32 -> vector<20x256xf32>
    %cst_39 = arith.constant 0.000000e+00 : f32
    %179 = vector.shape_cast %115 : vector<1x256xi1> to vector<1x256xi1>
    %180 = vector.broadcast %179 : vector<1x256xi1> to vector<20x256xi1>
    %181 = vector.broadcast %cst_39 : f32 to vector<20x256xf32>
    %182 = arith.select %180, %178, %181 : vector<20x256xi1>, vector<20x256xf32>
    %183 = vector.broadcast %111 : vector<20x1xf32> to vector<20x256xf32>
    %184 = arith.mulf %182, %183 : vector<20x256xf32>
    %185 = arith.addf %177, %184 : vector<20x256xf32>
    %186 = arith.mulf %185, %185 : vector<20x256xf32>
    %187 = arith.mulf %185, %186 : vector<20x256xf32>
    %cst_40 = arith.constant 4.471500e-02 : f32
    %188 = vector.broadcast %cst_40 : f32 to vector<20x256xf32>
    %189 = arith.mulf %188, %187 : vector<20x256xf32>
    %190 = arith.addf %185, %189 : vector<20x256xf32>
    %cst_41 = arith.constant 0.797884583 : f32
    %191 = vector.broadcast %cst_41 : f32 to vector<20x256xf32>
    %192 = arith.mulf %191, %190 : vector<20x256xf32>
    %193 = math.tanh %192 : vector<20x256xf32>
    %cst_42 = arith.constant 1.000000e+00 : f32
    %194 = vector.broadcast %cst_42 : f32 to vector<20x256xf32>
    %195 = arith.addf %194, %193 : vector<20x256xf32>
    %cst_43 = arith.constant 5.000000e-01 : f32
    %196 = vector.broadcast %cst_43 : f32 to vector<20x256xf32>
    %197 = arith.mulf %196, %195 : vector<20x256xf32>
    %198 = arith.mulf %185, %197 : vector<20x256xf32>
    %199 = tpu.iota {dimensions = array<i32: 0>} : vector<20x1xi32>
    %cst_44 = arith.constant 0.000000e+00 : f32
    %200 = vector.broadcast %cst_44 : f32 to vector<20x256xf32>
    %c0_i32_45 = arith.constant 0 : i32
    %201 = vector.broadcast %c0_i32_45 : i32 to vector<20x1xi32>
    %202 = arith.cmpi sge, %199, %201 : vector<20x1xi32>
    %c4_i32_46 = arith.constant 4 : i32
    %203 = vector.broadcast %c4_i32_46 : i32 to vector<20x1xi32>
    %204 = arith.cmpi slt, %199, %203 : vector<20x1xi32>
    %205 = arith.andi %202, %204 : vector<20x1xi1>
    %c14_i32_47 = arith.constant 14 : i32
    %206 = vector.broadcast %c14_i32_47 : i32 to vector<1x256xi32>
    %207 = arith.cmpi slt, %33, %206 : vector<1x256xi32>
    %208 = vector.broadcast %205 : vector<20x1xi1> to vector<20x256xi1>
    %209 = vector.broadcast %207 : vector<1x256xi1> to vector<20x256xi1>
    %210 = arith.andi %208, %209 : vector<20x256xi1>
    %c254_i32 = arith.constant 254 : i32
    %211 = tpu.dynamic_rotate %198 by %c254_i32 dim 1 : vector<20x256xf32>, i32 -> vector<20x256xf32>
    %212 = arith.select %210, %211, %200 : vector<20x256xi1>, vector<20x256xf32>
    %c4_i32_48 = arith.constant 4 : i32
    %213 = vector.broadcast %c4_i32_48 : i32 to vector<20x1xi32>
    %214 = arith.cmpi sge, %199, %213 : vector<20x1xi32>
    %c8_i32_49 = arith.constant 8 : i32
    %215 = vector.broadcast %c8_i32_49 : i32 to vector<20x1xi32>
    %216 = arith.cmpi slt, %199, %215 : vector<20x1xi32>
    %217 = arith.andi %214, %216 : vector<20x1xi1>
    %c15_i32_50 = arith.constant 15 : i32
    %218 = vector.broadcast %c15_i32_50 : i32 to vector<1x256xi32>
    %219 = arith.cmpi slt, %33, %218 : vector<1x256xi32>
    %220 = vector.broadcast %217 : vector<20x1xi1> to vector<20x256xi1>
    %221 = vector.broadcast %219 : vector<1x256xi1> to vector<20x256xi1>
    %222 = arith.andi %220, %221 : vector<20x256xi1>
    %c255_i32_51 = arith.constant 255 : i32
    %223 = tpu.dynamic_rotate %198 by %c255_i32_51 dim 1 : vector<20x256xf32>, i32 -> vector<20x256xf32>
    %224 = arith.select %222, %223, %212 : vector<20x256xi1>, vector<20x256xf32>
    %c8_i32_52 = arith.constant 8 : i32
    %225 = vector.broadcast %c8_i32_52 : i32 to vector<20x1xi32>
    %226 = arith.cmpi sge, %199, %225 : vector<20x1xi32>
    %c12_i32 = arith.constant 12 : i32
    %227 = vector.broadcast %c12_i32 : i32 to vector<20x1xi32>
    %228 = arith.cmpi slt, %199, %227 : vector<20x1xi32>
    %229 = arith.andi %226, %228 : vector<20x1xi1>
    %230 = vector.shape_cast %229 : vector<20x1xi1> to vector<20x1xi1>
    %231 = vector.broadcast %230 : vector<20x1xi1> to vector<20x256xi1>
    %232 = arith.select %231, %198, %224 : vector<20x256xi1>, vector<20x256xf32>
    %c12_i32_53 = arith.constant 12 : i32
    %233 = vector.broadcast %c12_i32_53 : i32 to vector<20x1xi32>
    %234 = arith.cmpi sge, %199, %233 : vector<20x1xi32>
    %c16_i32_54 = arith.constant 16 : i32
    %235 = vector.broadcast %c16_i32_54 : i32 to vector<20x1xi32>
    %236 = arith.cmpi slt, %199, %235 : vector<20x1xi32>
    %237 = arith.andi %234, %236 : vector<20x1xi1>
    %c1_i32_55 = arith.constant 1 : i32
    %238 = vector.broadcast %c1_i32_55 : i32 to vector<1x256xi32>
    %239 = arith.cmpi sge, %33, %238 : vector<1x256xi32>
    %240 = vector.broadcast %237 : vector<20x1xi1> to vector<20x256xi1>
    %241 = vector.broadcast %239 : vector<1x256xi1> to vector<20x256xi1>
    %242 = arith.andi %240, %241 : vector<20x256xi1>
    %c1_i32_56 = arith.constant 1 : i32
    %243 = tpu.dynamic_rotate %198 by %c1_i32_56 dim 1 : vector<20x256xf32>, i32 -> vector<20x256xf32>
    %244 = arith.select %242, %243, %232 : vector<20x256xi1>, vector<20x256xf32>
    %c16_i32_57 = arith.constant 16 : i32
    %245 = vector.broadcast %c16_i32_57 : i32 to vector<20x1xi32>
    %246 = arith.cmpi sge, %199, %245 : vector<20x1xi32>
    %c20_i32 = arith.constant 20 : i32
    %247 = vector.broadcast %c20_i32 : i32 to vector<20x1xi32>
    %248 = arith.cmpi slt, %199, %247 : vector<20x1xi32>
    %249 = arith.andi %246, %248 : vector<20x1xi1>
    %c2_i32_58 = arith.constant 2 : i32
    %250 = vector.broadcast %c2_i32_58 : i32 to vector<1x256xi32>
    %251 = arith.cmpi sge, %33, %250 : vector<1x256xi32>
    %252 = vector.broadcast %249 : vector<20x1xi1> to vector<20x256xi1>
    %253 = vector.broadcast %251 : vector<1x256xi1> to vector<20x256xi1>
    %254 = arith.andi %252, %253 : vector<20x256xi1>
    %c2_i32_59 = arith.constant 2 : i32
    %255 = tpu.dynamic_rotate %198 by %c2_i32_59 dim 1 : vector<20x256xf32>, i32 -> vector<20x256xf32>
    %256 = arith.select %254, %255, %244 : vector<20x256xi1>, vector<20x256xf32>
    %c0_60 = arith.constant 0 : index
    %c0_61 = arith.constant 0 : index
    %257 = vector.load %arg5[%c0_60, %c0_61] : memref<10x20xf32, #tpu.memory_space<vmem>>, vector<10x20xf32>
    %cst_62 = arith.constant dense<0.000000e+00> : vector<10x256xf32>
    %258 = tpu.matmul %257, %256, %cst_62 {dimension_numbers = #tpu.dot_dimension_numbers<[1], [0], [0], [1], [0, 0, 1, 1], [], []>} : vector<10x20xf32>, vector<20x256xf32>, vector<10x256xf32> -> vector<10x256xf32>
    %c0_63 = arith.constant 0 : index
    %c0_64 = arith.constant 0 : index
    %259 = vector.load %arg6[%c0_63, %c0_64] : memref<10x256xf32, #tpu.memory_space<vmem>>, vector<10x256xf32>
    tpu.vector_store %arg6[%c0_63, %c0_64], %258 {strides = array<i32>} : memref<10x256xf32, #tpu.memory_space<vmem>>, vector<10x256xf32>,
    return
  }
  func.func @transform_0(%arg0: i32) -> (i32, i32) {
    %c0_i32 = arith.constant 0 : i32
    %c0_i32_0 = arith.constant 0 : i32
    return %c0_i32, %arg0 : i32, i32
  }
  func.func @transform_1(%arg0: i32) -> (i32, i32) {
    %c0_i32 = arith.constant 0 : i32
    %c0_i32_0 = arith.constant 0 : i32
    %c0_i32_1 = arith.constant 0 : i32
    return %c0_i32, %c0_i32_0 : i32, i32
  }
  func.func @transform_2(%arg0: i32) -> (i32, i32) {
    %c0_i32 = arith.constant 0 : i32
    %c0_i32_0 = arith.constant 0 : i32
    %c0_i32_1 = arith.constant 0 : i32
    return %c0_i32, %c0_i32_0 : i32, i32
  }
  func.func @transform_3(%arg0: i32) -> (i32, i32) {
    %c0_i32 = arith.constant 0 : i32
    %c0_i32_0 = arith.constant 0 : i32
    %c0_i32_1 = arith.constant 0 : i32
    return %c0_i32, %c0_i32_0 : i32, i32
  }
  func.func @transform_4(%arg0: i32) -> (i32, i32) {
    %c0_i32 = arith.constant 0 : i32
    %c0_i32_0 = arith.constant 0 : i32
    %c0_i32_1 = arith.constant 0 : i32
    return %c0_i32, %c0_i32_0 : i32, i32
  }
  func.func @transform_5(%arg0: i32) -> (i32, i32) {
    %c0_i32 = arith.constant 0 : i32
    %c0_i32_0 = arith.constant 0 : i32
    return %c0_i32, %arg0 : i32, i32
  }
}

</mosaic_0001>

<bundles_post_ra>
// kernel: _lambda_.1
= control target key start
LH: loop header
LB: loop body
LE: loop exit
PB: predicated region body
PF: predicated region fallthrough
CT: control target
= control target key end

     0   :  { %s1678_s18 = smov 0   ;;  %s1680_s19 = smov 0   ;;  %s2501_s0 = inlined_call_operand.vmem [shape: f32[10,512], index: 0, kind: input, shape index: {}]   ;;  %s2502_s1 = inlined_call_operand.vmem [shape: f32[20,10], index: 1, kind: input, shape index: {}]   ;;  %s2503_s2 = inlined_call_operand.vmem [shape: f32[20,9], index: 2, kind: input, shape index: {}]   ;;  %s2504_s3 = inlined_call_operand.vmem [shape: f32[20,1], index: 3, kind: input, shape index: {}]   ;;  %s2505_s4 = inlined_call_operand.vmem [shape: f32[10,20], index: 4, kind: input, shape index: {}]   ;;  %s2506_s5 = inlined_call_operand.vmem [shape: f32[10,512], index: 5, kind: output, shape index: {}]  }
   0x1   :  { %s1682_s20 = smov 0  }
   0x2 LB: > { %s1496_s21 = sadd.s32 4294967295, %s1624_s20   ;;  %s1695_s22 = sadd.s32 1, %s1624_s20   ;;  %s1624_s20 = sphi %s1682_s20, %s2559_s20   ;;  %s1620_s19 = sphi %s1680_s19, %s2558_s19   ;;  %s1616_s18 = sphi %s1678_s18, %s2557_s18  }
   0x3   : > { %s19_s23 = ssub.s32 %s1624_s20, %s1695_s22  ;;  %s22_s24 = sadd.s32 1, %s1620_s19 }
   0x4   : > { %p20_p0 = scmp.eq.s32.totalorder %s19_s23, 0  ;;  %p29_p1 = scmp.ne.s32.totalorder %s1620_s19, %s1616_s18 }
   0x5   : > { %p30_p2 = scmp.eq.s32.totalorder %s1624_s20, 0  ;;  %p143_p3 = scmp.eq.s32.totalorder %s1496_s21, 1 }
   0x6   : > { %s1706_s25 = scalar_select %p20_p0, %s1620_s19, %s22_s24  }
   0x7   : > { %p31_p4 = por %p30_p2, %p29_p1  ;;  %p1708_p5 = por %p143_p3, %p29_p1 }
   0x8   : > { %p1499_p6 = scmp.ge.s32.totalorder %s1624_s20, 2 }
   0xa   : > { %177 = sbr.rel (%p1499_p6) target bundleno = 21 (0x15), region = 32 }
   0xf   : > { %180 = sbr.rel (!%p31_p4) target bundleno = 21 (0x15), region = 36  ;;  %s182_s27 = sand.u32 (%p31_p4), 1, %s1620_s19  }
  0x10   : > { %s1520_s28 = sshll.u32 (%p31_p4), %s1624_s20, 4  ;;  %s1500_s29 = sshll.u32 (%p31_p4), %s182_s27, 5 }
  0x11   : > { %s187_s7 = scalar_lea.vmem (%p31_p4), %s2501_s0, %s1520_s28  ;;  %s184_s8 = scalar_lea.vmem (%p31_p4), [#allocation2], %s1500_s29 }
  0x12   : > { %v200_v0 = vld [vmem:[%s187_s7] sm:$0xff] (%p31_p4)  ;;  %v202_v1 = vld [vmem:[%s187_s7 + $0x8] sm:$0xff] (%p31_p4) }
  0x13   : > { %v204_v2 = vld [vmem:[%s187_s7 + $0x20] sm:$0xff] (%p31_p4)  ;;  %201 = vst [vmem:[%s184_s8] sm:$0xff] (%p31_p4), %v200_v0  ;;  %203 = vst [vmem:[%s184_s8 + $0x8] sm:$0xff] (%p31_p4), %v202_v1  ;;  %v206_v3 = vld [vmem:[%s187_s7 + $0x28] sm:$0xff] (%p31_p4) }
  0x14   : > { %205 = vst [vmem:[%s184_s8 + $0x10] sm:$0xff] %v204_v2  ;;  %207 = vst [vmem:[%s184_s8 + $0x18] sm:$0xff] %v206_v3 }
  0x15 PF: > { %p1503_p7 = scmp.ge.s32.totalorder %s1624_s20, 1  ;;  %p212_p8 = scmp.lt.s32.totalorder %s1624_s20, 3 }
  0x17   : > { %p213_p9 = pnand %p1503_p7, %p212_p8 }
  0x19   : > { %216 = sbr.rel (%p213_p9) target bundleno = 957 (0x3bd), region = 59 }
  0x1e   : > { %s219_s9 = sand.u32 1, %s1616_s18   ;;  %s1626_s12 = smov 112   ;;  %v2507_v8 = vmov 0.0   ;;  %v1630_v9 = vmov 0   ;;  %v1631_v10 = vmov 1   ;;  %v575_v13 = vld [vmem:[%s2503_s2 + $0x8] sm:$0xff]  ;;  %v251_v24 = vlaneseq }
  0x1f   : > { %s1721_s10 = sshll.u32 %s219_s9, 5  ;;  %s1627_s13 = smov 96   ;;  %555 = vmatprep.mubr.f32.mxu0 %v2507_v8  ;;  %1390 = vmatprep.mubr.f32.mxu1 %v2507_v8  ;;  %v587_v11 = vld [vmem:[%s2504_s3 + $0x10] sm:$0xf]  ;;  %v586_v14 = vld [vmem:[%s2504_s3 + $0x8] sm:$0xff]  ;;  %v574_v15 = vld [vmem:[%s2503_s2] sm:$0xff] }
  0x20   : > { %s221_s11 = scalar_lea.vmem [#allocation2], %s1721_s10  ;;  %s1629_s14 = smov 32   ;;  %1568 = vset.pattern.permute.xlu1 %v1630_v9  ;;  %1569 = vset.pattern.permute.xlu0 %v1631_v10  ;;  %v576_v12 = vld [vmem:[%s2503_s2 + $0x10] sm:$0xf]  ;;  %v1633_v16 = vmov 2   ;;  %v585_v17 = vld [vmem:[%s2504_s3] sm:$0xff] }
  0x21   : > { %v1724_v4 = vld [vmem:[%s221_s11] sm:$0xff]  ;;  %v1729_v5 = vld [vmem:[%s221_s11 + $0x8] sm:$0xff]  ;;  %v250_v6 = vld [vmem:[%s221_s11 + $0x18] sm:$0x3]  ;;  %s1632_s15 = smov 16   ;;  %v1634_v18 = vmov 3  }
  0x22   : > { %368 = vrot.lane.b32.xlu1 %v1724_v4, %s1626_s12  ;;  %333 = vrot.lane.b32.xlu0 %v1724_v4, %s1627_s13  ;;  %v249_v7 = vld [vmem:[%s221_s11 + $0x10] sm:$0x3]  ;;  %v1635_v19 = vmov 4   ;;  %v1636_v20 = vmov 5   ;;  %v1637_v21 = vmov 6   ;;  %v1638_v22 = vmov 7  }
  0x23   : > { %v1639_v23 = vmov 8   ;;  %v1758_v25 = vand.u32 127, %v251_v24  ;;  %v1763_v27 = vshrl.u32 %v251_v24, 7  ;;  %v471_v62 = vld [vmem:[%s2502_s1] sm:$0xff]  ;;  %v472_v63 = vld [vmem:[%s2502_s1 + $0x8] sm:$0xff]  ;;  %s1640_s18 = smov 17  }
  0x24   : > { %v473_v0 = vld [vmem:[%s2502_s1 + $0x10] sm:$0xf]  ;;  %s1641_s23 = smov 15   ;;  %s1642_s24 = smov 1  }
  0x25   : > { %v1761_v26 = vadd.s32 128, %v1758_v25  ;;  %vm350_vm0 = vcmp.ge.s32.totalorder %v1763_v27, 2  ;;  %vm2511_vm1 = vcmp.lt.s32.totalorder %v1763_v27, 4  ;;  %v258_v31 = vand.u32 255, %v1758_v25  ;;  %s1643_s27 = smov 127   ;;  %s1644_s28 = smov 113  }
  0x26   : > { %372 = vrot.lane.b32.xlu1 %v1729_v5, %s1626_s12  ;;  %337 = vrot.lane.b32.xlu0 %v1729_v5, %s1627_s13  ;;  %v1770_v32 = vadd.s32 8, %v1763_v27  ;;  %vm315_vm2 = vcmp.lt.s32.totalorder %v1763_v27, 2  ;;  %vm341_vm4 = vcmp.lt.s32.totalorder %v1758_v25, 96  ;;  %vm1780_vm6 = vmand %vm350_vm0, %vm2511_vm1  ;;  %vm376_vm7 = vcmp.lt.s32.totalorder %v1758_v25, 112  ;;  %s1645_s29 = smov 111   ;;  %s244_s9 = scalar_lea.vmem [#allocation3], %s1721_s10 }
  0x27   : > { %v265_v28 = vand.u32 255, %v1761_v26  ;;  %vm440_vm10 = vcmp.ge.s32.totalorder %v258_v31, 32  ;;  %vm462_vm12 = vcmp.lt.s32.totalorder %v1758_v25, 32  ;;  %vm2510_vm13 = vcmp.ge.s32.totalorder %v1763_v27, 4  ;;  %s1521_s11 = sshll.u32 (%p1708_p5), %s1496_s21, 4 }
  0x28   : > { %2515 = vst [vmem:[#allocation4_spill] sm:$0xff] %v1770_v32  ;;  %vm437_vm9 = vcmp.lt.s32.totalorder %v1770_v32, 10  ;;  %vm387_vm14 = vcmp.lt.s32.totalorder %v1763_v27, 6  ;;  %vm1813_vm0 = vcmp.ge.s32.totalorder %v258_v31, 16  ;;  %s1416_s10 = scalar_lea.vmem (%p1708_p5), %s2506_s5, %s1521_s11 }
  0x29   : > { %vm320_vm3 = vcmp.lt.s32.totalorder %v265_v28, 224  ;;  %vm1774_vm5 = vcmp.lt.s32.totalorder %v265_v28, 240  ;;  %vm1809_vm15 = vmand %vm437_vm9, %vm440_vm10 }
  0x2a   : > { %460 = vrot.lane.b32.xlu1 %v250_v6, %s1629_s14  ;;  %456 = vrot.lane.b32.xlu0 %v249_v7, %s1629_s14  ;;  %vm1787_vm8 = vmand %vm315_vm2, %vm320_vm3  ;;  %vm484_vm3 = vcmask 1041408  }
  0x2b   : > { %vm365_vm11 = vmand %vm1780_vm6, %vm1774_vm5 }
  0x2e   : > { %421 = vrot.lane.b32.xlu1 %v1729_v5, %s1632_s15  ;;  %417 = vrot.lane.b32.xlu0 %v1724_v4, %s1632_s15 }
  0x32   : > { %600 = vperm.xlu1 %1568, %v587_v11   ;;  %692 = vperm.xlu0 %1569, %v576_v12  }
  0x36   : > { %639 = vperm.xlu1 %1568, %v575_v13   ;;  %1570 = vset.pattern.permute.xlu0 %v1630_v9 }
  0x37   : > { %644 = vperm.xlu0 %1570, %v576_v12  }
  0x3a   : > { %595 = vperm.xlu1 %1568, %v586_v14  }
  0x3b   : > { %634 = vperm.xlu0 %1570, %v574_v15  }
  0x3e   : > { %1571 = vset.pattern.permute.xlu1 %v1631_v10 }
  0x3f   : > { %688 = vperm.xlu1 %1571, %v575_v13   ;;  %1572 = vset.pattern.permute.xlu0 %v1633_v16 }
  0x40   : > { %745 = vperm.xlu0 %1572, %v576_v12  }
  0x43   : > { %1573 = vset.pattern.permute.xlu1 %v1630_v9 }
  0x44   : > { %590 = vperm.xlu1 %1573, %v585_v17   ;;  %741 = vperm.xlu0 %1572, %v575_v13  }
  0x48   : > { %1574 = vset.pattern.permute.xlu1 %v1631_v10  ;;  %737 = vperm.xlu0 %1572, %v574_v15  }
  0x49   : > { %684 = vperm.xlu1 %1574, %v574_v15  }
  0x4c   : > { %1576 = vset.pattern.permute.xlu0 %v1634_v18 }
  0x4d   : > { %1575 = vset.pattern.permute.xlu1 %v1634_v18  ;;  %790 = vperm.xlu0 %1576, %v574_v15  }
  0x4e   : > { %798 = vperm.xlu1 %1575, %v576_v12  }
  0x51   : > { %1577 = vset.pattern.permute.xlu0 %v1635_v19 }
  0x52   : > { %794 = vperm.xlu1 %1575, %v575_v13   ;;  %822 = vperm.xlu0 %1577, %v576_v12  }
  0x56   : > { %1578 = vset.pattern.permute.xlu1 %v1636_v20  ;;  %818 = vperm.xlu0 %1577, %v575_v13  }
  0x57   : > { %875 = vperm.xlu1 %1578, %v576_v12  }
  0x5a   : > { %1580 = vset.pattern.permute.xlu0 %v1636_v20 }
  0x5b   : > { %1579 = vset.pattern.permute.xlu1 %v1635_v19  ;;  %871 = vperm.xlu0 %1580, %v575_v13  }
  0x5c   : > { %814 = vperm.xlu1 %1579, %v574_v15  }
  0x5f   : > { %1583 = vset.pattern.permute.xlu0 %v1637_v21 }
  0x60   : > { %1581 = vset.pattern.permute.xlu1 %v1637_v21  ;;  %924 = vperm.xlu0 %1583, %v575_v13  }
  0x61   : > { %928 = vperm.xlu1 %1581, %v576_v12  }
  0x64   : > { %1586 = vset.pattern.permute.xlu0 %v1638_v22 }
  0x65   : > { %1582 = vset.pattern.permute.xlu1 %v1636_v20  ;;  %972 = vperm.xlu0 %1586, %v575_v13  }
  0x66   : > { %867 = vperm.xlu1 %1582, %v574_v15  }
  0x69   : > { %1589 = vset.pattern.permute.xlu0 %v1639_v23 }
  0x6a   : > { %1584 = vset.pattern.permute.xlu1 %v1638_v22  ;;  %1025 = vperm.xlu0 %1589, %v575_v13  }
  0x6b   : > { %976 = vperm.xlu1 %1584, %v576_v12  }
  0x6e   : > { %1021 = vperm.xlu0 %1589, %v574_v15  }
  0x6f   : > { %1585 = vset.pattern.permute.xlu1 %v1637_v21 }
  0x70   : > { %920 = vperm.xlu1 %1585, %v574_v15  }
  0x74   : > { %1587 = vset.pattern.permute.xlu1 %v1639_v23 }
  0x75   : > { %1029 = vperm.xlu1 %1587, %v576_v12  }
  0x79   : > { %1588 = vset.pattern.permute.xlu1 %v1638_v22 }
  0x7a   : > { %968 = vperm.xlu1 %1588, %v574_v15  }
  0x94   : > { %v369_v29 = vpop.permute.xlu1 %368  ;;  %v334_v30 = vpop.permute.xlu0 %333 }
  0x98   : > { %v373_v35 = vpop.permute.xlu1 %372  ;;  %v338_v37 = vpop.permute.xlu0 %337 }
  0x99   : > { %v342_v38 = vsel %vm341_vm4, %v334_v30, %v338_v37  ;;  %v344_v39 = vsel %vm341_vm4, %v338_v37, %v334_v30  ;;  %v377_v40 = vsel %vm376_vm7, %v369_v29, %v373_v35  ;;  %v379_v41 = vsel %vm376_vm7, %v373_v35, %v369_v29 }
  0x9a   : > { %v346_v42 = vsel %vm315_vm2, %v342_v38, 0.0  ;;  %v347_v43 = vsel %vm1787_vm8, %v344_v39, 0.0  ;;  %vm399_vm4 = vcmp.ge.s32.totalorder %v1763_v27, 6  ;;  %vm425_vm2 = vcmp.lt.s32.totalorder %v1758_v25, 16  ;;  %vm389_vm8 = vmand %vm2510_vm13, %vm387_vm14 }
  0x9b   : > { %v381_v50 = vsel %vm1780_vm6, %v377_v40, %v346_v42  ;;  %v382_v51 = vsel %vm365_vm11, %v379_v41, %v347_v43  ;;  %vm413_vm10 = vmand %vm399_vm4, %vm1813_vm0  ;;  %vm474_vm6 = vcmask 80896   ;;  %vm615_vm11 = vcmp.lt.s32.totalorder %v1758_v25, 17 }
  0x9c   : > { %v461_v45 = vpop.permute.xlu1 %460  ;;  %v457_v46 = vpop.permute.xlu0 %456  ;;  %v396_v58 = vsel %vm389_vm8, %v1729_v5, %v382_v51  ;;  %v395_v59 = vsel %vm389_vm8, %v1724_v4, %v381_v50  ;;  %vm772_vm8 = vcmp.lt.s32.totalorder %v1758_v25, 1  ;;  %vm902_vm13 = vcmp.lt.s32.totalorder %v1758_v25, 113 }
  0x9d   : > { %v466_v48 = vsel %vm462_vm12, %v461_v45, %v457_v46  ;;  %v464_v49 = vsel %vm462_vm12, %v457_v46, %v461_v45  ;;  %v2026_v45 = vand.u32 15, %v1758_v25  ;;  %v2029_v46 = vand.u32 15, %v1761_v26 }
  0x9e   : > { %v470_v52 = vsel %vm437_vm9, %v464_v49, 0.0  ;;  %v469_v53 = vsel %vm1809_vm15, %v466_v48, 0.0  ;;  %vm719_vm15 = vcmp.lt.s32.totalorder %v1758_v25, 15 }
  0x9f   : > { %1506 = vmatprep.subr.msk.mxu0 %vm484_vm3, %v470_v52  ;;  %vm2513_vm9 = vcmp.ge.s32.totalorder %v2026_v45, 1  ;;  %vm307_vm12 = vcmp.ge.s32.totalorder %v2029_v46, 1 }
  0xa0   : > { %v422_v54 = vpop.permute.xlu1 %421  ;;  %1507 = vmatpush1.msk.msra.mxu0 %vm484_vm3, %v469_v53  ;;  %v418_v55 = vpop.permute.xlu0 %417  ;;  %vm2038_vm14 = vmand %vm1813_vm0, %vm2513_vm9  ;;  %vm308_vm3 = vcmp.le.s32.totalorder %v2026_v45, 14 }
  0xa1   : > { %v426_v56 = vsel %vm425_vm2, %v418_v55, %v422_v54  ;;  %v428_v57 = vsel %vm425_vm2, %v422_v54, %v418_v55  ;;  %vm2106_vm1 = vmand %vm1774_vm5, %vm307_vm12 }
  0xa2   : > { %v431_v60 = vsel %vm399_vm4, %v426_v56, %v396_v58  ;;  %v430_v61 = vsel %vm413_vm10, %v428_v57, %v395_v59  ;;  %vm309_vm4 = vcmp.le.s32.totalorder %v2029_v46, 14  ;;  %vm2064_vm10 = vmand %vm1813_vm0, %vm308_vm3 }
  0xa3   : > { %521 = vmatprep.subr.mxu0 %v431_v60 }
  0xa4   : > { %522 = vmatpush1.msra.mxu0 %v430_v61 }
  0xa5   : > { %1508 = vmatmul.mubr.msk.f32.vlgmr.msra.gmra.mxu0 %vm474_vm6, %v471_v62 }
  0xa6   : > { %561 = vmatprep.mubr.f32.mxu0 %v2507_v8 }
  0xa9   : > { %1509 = vmatmul.mubr.msk.f32.gmra.mxu0 %vm474_vm6, %v472_v63 }
  0xaa   : > { %567 = vmatprep.mubr.f32.mxu0 %v2507_v8 }
  0xad   : > { %1510 = vmatmul.mubr.msk.f32.gmra.mxu0 %vm474_vm6, %v473_v0  ;;  %v1883_v4 = vpop.permute.xlu1 %600  ;;  %v1903_v9 = vpop.permute.xlu0 %692  ;;  %vm2512_vm6 = vcmp.lt.s32.totalorder %v1758_v25, 127 }
  0xb1   : > { %v1895_v6 = vpop.permute.xlu1 %639 }
  0xb2   : > { %v1917_v12 = vpop.permute.xlu0 %644 }
  0xb5   : > { %v1901_v7 = vpop.permute.xlu1 %595 }
  0xb6   : > { %v1925_v14 = vpop.permute.xlu0 %634 }
  0xba   : > { %v1915_v11 = vpop.permute.xlu1 %688 }
  0xbb   : > { %v1939_v17 = vpop.permute.xlu0 %745 }
  0xbf   : > { %v1923_v13 = vpop.permute.xlu1 %590  ;;  %v1947_v19 = vpop.permute.xlu0 %741 }
  0xc3   : > { %v1959_v21 = vpop.permute.xlu0 %737 }
  0xc4   : > { %v1937_v16 = vpop.permute.xlu1 %684 }
  0xc8   : > { %v1967_v23 = vpop.permute.xlu0 %790 }
  0xc9   : > { %v1945_v18 = vpop.permute.xlu1 %798 }
  0xcd   : > { %v1957_v20 = vpop.permute.xlu1 %794  ;;  %v1979_v28 = vpop.permute.xlu0 %822 }
  0xd1   : > { %v1987_v30 = vpop.permute.xlu0 %818 }
  0xd2   : > { %v1965_v22 = vpop.permute.xlu1 %875 }
  0xd6   : > { %v1995_v34 = vpop.permute.xlu0 %871 }
  0xd7   : > { %v1977_v24 = vpop.permute.xlu1 %814 }
  0xdb   : > { %v2001_v36 = vpop.permute.xlu0 %924 }
  0xdc   : > { %v1985_v29 = vpop.permute.xlu1 %928 }
  0xe0   : > { %v2009_v38 = vpop.permute.xlu0 %972 }
  0xe1   : > { %v1993_v31 = vpop.permute.xlu1 %867 }
  0xe5   : > { %v2015_v40 = vpop.permute.xlu0 %1025 }
  0xe6   : > { %v1999_v35 = vpop.permute.xlu1 %976 }
  0xe9   : > { %v2023_v42 = vpop.permute.xlu0 %1021 }
  0xeb   : > { %v2007_v37 = vpop.permute.xlu1 %920 }
  0xf0   : > { %v2013_v39 = vpop.permute.xlu1 %1029 }
  0xf5   : > { %v2021_v41 = vpop.permute.xlu1 %968 }
 0x165   : > { %v1857_v1 = vpop.f32.mrf.mxu0 }
 0x166   : > { %659 = vrot.lane.b32.xlu1 %v1857_v1, %s1632_s15  ;;  %603 = vrot.lane.b32.xlu0 %v1857_v1, %s1640_s18 }
 0x167   : > { %v1867_v2 = vpop.f32.mrf.mxu0 }
 0x169   : > { %v1881_v3 = vpop.f32.mrf.mxu0 }
 0x16a   : > { %707 = vrot.lane.b32.xlu1 %v1857_v1, %s1641_s23  ;;  %760 = vrot.lane.b32.xlu0 %v1857_v1, %s1642_s24 }
 0x16b   : > { %v1889_v5 = vpop.f32.mrf.mxu0 }
 0x16d   : > { %v1913_v10 = vpop.f32.mrf.mxu0 }
 0x16e   : > { %837 = vrot.lane.b32.xlu0 %v1857_v1, %s1643_s27  ;;  %609 = vrot.lane.b32.xlu1 %v1867_v2, %s1640_s18 }
 0x16f   : > { %v1935_v15 = vpop.f32.mrf.mxu0 }
 0x172   : > { %890 = vrot.lane.b32.xlu0 %v1857_v1, %s1644_s28  ;;  %713 = vrot.lane.b32.xlu1 %v1867_v2, %s1641_s23 }
 0x176   : > { %665 = vrot.lane.b32.xlu0 %v1867_v2, %s1632_s15  ;;  %766 = vrot.lane.b32.xlu1 %v1867_v2, %s1642_s24 }
 0x17a   : > { %843 = vrot.lane.b32.xlu1 %v1867_v2, %s1643_s27  ;;  %661 = vrot.lane.b32.xlu0 %v1881_v3, %s1632_s15 }
 0x17e   : > { %896 = vrot.lane.b32.xlu1 %v1867_v2, %s1644_s28  ;;  %611 = vrot.lane.b32.xlu0 %v1889_v5, %s1640_s18 }
 0x182   : > { %605 = vrot.lane.b32.xlu1 %v1881_v3, %s1640_s18  ;;  %768 = vrot.lane.b32.xlu0 %v1889_v5, %s1642_s24 }
 0x186   : > { %709 = vrot.lane.b32.xlu1 %v1881_v3, %s1641_s23  ;;  %845 = vrot.lane.b32.xlu0 %v1889_v5, %s1643_s27 }
 0x18a   : > { %762 = vrot.lane.b32.xlu1 %v1881_v3, %s1642_s24  ;;  %898 = vrot.lane.b32.xlu0 %v1889_v5, %s1644_s28 }
 0x18e   : > { %839 = vrot.lane.b32.xlu1 %v1881_v3, %s1643_s27  ;;  %711 = vrot.lane.b32.xlu0 %v1913_v10, %s1641_s23 }
 0x192   : > { %892 = vrot.lane.b32.xlu1 %v1881_v3, %s1644_s28  ;;  %764 = vrot.lane.b32.xlu0 %v1913_v10, %s1642_s24 }
 0x196   : > { %945 = vrot.lane.b32.xlu1 %v1881_v3, %s1626_s12  ;;  %995 = vrot.lane.b32.xlu0 %v1913_v10, %s1645_s29 }
 0x19a   : > { %667 = vrot.lane.b32.xlu1 %v1889_v5, %s1632_s15  ;;  %669 = vrot.lane.b32.xlu0 %v1935_v15, %s1632_s15 }
 0x19e   : > { %715 = vrot.lane.b32.xlu1 %v1889_v5, %s1641_s23  ;;  %949 = vrot.lane.b32.xlu0 %v1867_v2, %s1626_s12 }
 0x1a2   : > { %951 = vrot.lane.b32.xlu1 %v1889_v5, %s1626_s12  ;;  %847 = vrot.lane.b32.xlu0 %v1935_v15, %s1643_s27 }
 0x1a6   : > { %607 = vrot.lane.b32.xlu1 %v1913_v10, %s1640_s18  ;;  %900 = vrot.lane.b32.xlu0 %v1935_v15, %s1644_s28 }
 0x1aa   : > { %663 = vrot.lane.b32.xlu1 %v1913_v10, %s1632_s15  ;;  %953 = vrot.lane.b32.xlu0 %v1935_v15, %s1626_s12  ;;  %s1647_s15 = smov 2  }
 0x1ae   : > { %841 = vrot.lane.b32.xlu1 %v1913_v10, %s1643_s27  ;;  %999 = vrot.lane.b32.xlu0 %v1889_v5, %s1645_s29 }
 0x1b2   : > { %894 = vrot.lane.b32.xlu1 %v1913_v10, %s1644_s28  ;;  %997 = vrot.lane.b32.xlu0 %v1867_v2, %s1645_s29 }
 0x1b6   : > { %947 = vrot.lane.b32.xlu1 %v1913_v10, %s1626_s12 }
 0x1ba   : > { %613 = vrot.lane.b32.xlu1 %v1935_v15, %s1640_s18 }
 0x1be   : > { %717 = vrot.lane.b32.xlu1 %v1935_v15, %s1641_s23 }
 0x1c2   : > { %770 = vrot.lane.b32.xlu1 %v1935_v15, %s1642_s24 }
 0x1c6   : > { %943 = vrot.lane.b32.xlu1 %v1857_v1, %s1626_s12  ;;  %s1646_s12 = smov 126  }
 0x1ca   : > { %993 = vrot.lane.b32.xlu1 %v1881_v3, %s1645_s29 }
 0x1ce   : > { %1001 = vrot.lane.b32.xlu1 %v1935_v15, %s1645_s29 }
 0x1d2   : > { %991 = vrot.lane.b32.xlu1 %v1857_v1, %s1645_s29 }
 0x1d8   : > { %v660_v43 = vpop.permute.xlu1 %659  ;;  %v604_v44 = vpop.permute.xlu0 %603 }
 0x1dc   : > { %v708_v48 = vpop.permute.xlu1 %707  ;;  %v761_v49 = vpop.permute.xlu0 %760 }
 0x1e0   : > { %v610_v50 = vpop.permute.xlu1 %609  ;;  %v838_v51 = vpop.permute.xlu0 %837 }
 0x1e1   : > { %v616_v26 = vsel %vm615_vm11, %v604_v44, %v610_v50  ;;  %v619_v53 = vsel %vm615_vm11, %v610_v50, %v604_v44 }
 0x1e2   : > { %v627_v54 = vsel %vm307_vm12, %v616_v26, 0.0  ;;  %v626_v55 = vsel %vm2038_vm14, %v619_v53, 0.0 }
 0x1e3   : > { %v648_v60 = vmul.f32 %v1925_v14, %v627_v54  ;;  %v647_v61 = vmul.f32 %v1925_v14, %v626_v55 }
 0x1e4   : > { %v714_v56 = vpop.permute.xlu1 %713  ;;  %v891_v57 = vpop.permute.xlu0 %890 }
 0x1e5   : > { %v720_v58 = vsel %vm719_vm15, %v708_v48, %v714_v56  ;;  %v723_v59 = vsel %vm719_vm15, %v714_v56, %v708_v48  ;;  %v654_v53 = vadd.f32 %v648_v60, %v1923_v13 }
 0x1e6   : > { %v731_v63 = vsel %vm309_vm4, %v720_v58, 0.0  ;;  %v730_v54 = vsel %vm2064_vm10, %v723_v59, 0.0  ;;  %v653_v58 = vadd.f32 %v647_v61, %v1923_v13 }
 0x1e7   : > { %v749_v8 = vmul.f32 %v1959_v21, %v731_v63  ;;  %v748_v59 = vmul.f32 %v1959_v21, %v730_v54 }
 0x1e8   : > { %v767_v0 = vpop.permute.xlu1 %766  ;;  %v666_v44 = vpop.permute.xlu0 %665 }
 0x1e9   : > { %v773_v48 = vsel %vm772_vm8, %v761_v49, %v767_v0  ;;  %v776_v14 = vsel %vm772_vm8, %v767_v0, %v761_v49  ;;  %v671_v50 = vsel %vm425_vm2, %v660_v43, %v666_v44  ;;  %v674_v26 = vsel %vm425_vm2, %v666_v44, %v660_v43 }
 0x1ea   : > { %v677_v55 = vsel %vm1813_vm0, %v674_v26, 0.0  ;;  %v696_v56 = vmul.f32 %v1937_v16, %v671_v50  ;;  %v784_v49 = vsel %vm307_vm12, %v773_v48, 0.0  ;;  %v783_v43 = vsel %vm2513_vm9, %v776_v14, 0.0 }
 0x1eb   : > { %v695_v0 = vmul.f32 %v1937_v16, %v677_v55  ;;  %v802_v61 = vmul.f32 %v1967_v23, %v784_v49  ;;  %v801_v63 = vmul.f32 %v1967_v23, %v783_v43 }
 0x1ec   : > { %v702_v60 = vadd.f32 %v696_v56, %v654_v53  ;;  %v844_v44 = vpop.permute.xlu1 %843  ;;  %v662_v16 = vpop.permute.xlu0 %661 }
 0x1ed   : > { %v701_v32 = vadd.f32 %v695_v0, %v653_v58  ;;  %v850_v50 = vsel %vm2512_vm6, %v838_v51, %v844_v44  ;;  %v853_v13 = vsel %vm2512_vm6, %v844_v44, %v838_v51 }
 0x1ee   : > { %v755_v48 = vadd.f32 %v749_v8, %v702_v60  ;;  %v861_v26 = vsel %vm309_vm4, %v853_v13, 0.0  ;;  %v826_v8 = vmul.f32 %v1977_v24, %v1867_v2  ;;  %v860_v53 = vsel %vm308_vm3, %v850_v50, 0.0 }
 0x1ef   : > { %v754_v14 = vadd.f32 %v748_v59, %v701_v32  ;;  %v825_v32 = vmul.f32 %v1977_v24, %v1857_v1  ;;  %v879_v49 = vmul.f32 %v1993_v31, %v861_v26  ;;  %v878_v60 = vmul.f32 %v1993_v31, %v860_v53 }
 0x1f0   : > { %v808_v51 = vadd.f32 %v802_v61, %v755_v48  ;;  %v897_v23 = vpop.permute.xlu1 %896  ;;  %v612_v44 = vpop.permute.xlu0 %611 }
 0x1f1   : > { %v807_v54 = vadd.f32 %v801_v63, %v754_v14  ;;  %v903_v55 = vsel %vm902_vm13, %v891_v57, %v897_v23  ;;  %v906_v56 = vsel %vm902_vm13, %v897_v23, %v891_v57 }
 0x1f2   : > { %v832_v58 = vadd.f32 %v826_v8, %v808_v51  ;;  %v913_v2 = vsel %vm2513_vm9, %v903_v55, 0.0  ;;  %v914_v0 = vsel %vm2106_vm1, %v906_v56, 0.0 }
 0x1f3   : > { %v831_v43 = vadd.f32 %v825_v32, %v807_v54  ;;  %v932_v1 = vmul.f32 %v2007_v37, %v914_v0  ;;  %v931_v57 = vmul.f32 %v2007_v37, %v913_v2 }
 0x1f4   : > { %v885_v24 = vadd.f32 %v879_v49, %v832_v58  ;;  %v606_v59 = vpop.permute.xlu1 %605  ;;  %v769_v63 = vpop.permute.xlu0 %768 }
 0x1f5   : > { %v884_v50 = vadd.f32 %v878_v60, %v831_v43  ;;  %v617_v31 = vsel %vm615_vm11, %v606_v59, %v612_v44  ;;  %v620_v53 = vsel %vm615_vm11, %v612_v44, %v606_v59 }
 0x1f6   : > { %v2128_v13 = vadd.f32 %v932_v1, %v885_v24  ;;  %v628_v37 = vsel %vm2038_vm14, %v620_v53, 0.0  ;;  %v629_v54 = vsel %vm307_vm12, %v617_v31, 0.0 }
 0x1f7   : > { %v2130_v61 = vadd.f32 %v931_v57, %v884_v50  ;;  %v649_v55 = vmul.f32 %v1895_v6, %v628_v37  ;;  %v650_v56 = vmul.f32 %v1895_v6, %v629_v54 }
 0x1f8   : > { %v710_v48 = vpop.permute.xlu1 %709  ;;  %v846_v26 = vpop.permute.xlu0 %845 }
 0x1f9   : > { %v655_v44 = vadd.f32 %v649_v55, %v1901_v7  ;;  %v656_v59 = vadd.f32 %v650_v56, %v1901_v7 }
 0x1fc   : > { %v763_v14 = vpop.permute.xlu1 %762  ;;  %v899_v23 = vpop.permute.xlu0 %898 }
 0x1fd   : > { %v774_v43 = vsel %vm772_vm8, %v763_v14, %v769_v63  ;;  %v777_v60 = vsel %vm772_vm8, %v769_v63, %v763_v14 }
 0x1fe   : > { %v786_v57 = vsel %vm307_vm12, %v774_v43, 0.0 }
 0x200   : > { %v840_v51 = vpop.permute.xlu1 %839  ;;  %v2144_v58 = vpop.permute.xlu0 %711 }
 0x201   : > { %v854_v31 = vsel %vm2512_vm6, %v846_v26, %v840_v51 }
 0x204   : > { %v893_v8 = vpop.permute.xlu1 %892  ;;  %v2172_v7 = vpop.permute.xlu0 %764 }
 0x208   : > { %v2136_v32 = vpop.permute.xlu1 %945 }
 0x20c   : > { %v668_v49 = vpop.permute.xlu1 %667 }
 0x20d   : > { %v672_v2 = vsel %vm425_vm2, %v662_v16, %v668_v49  ;;  %v675_v0 = vsel %vm425_vm2, %v668_v49, %v662_v16  ;;  %v785_v16 = vsel %vm2513_vm9, %v777_v60, 0.0 }
 0x20e   : > { %v679_v1 = vsel %vm1813_vm0, %v675_v0, 0.0  ;;  %v698_v24 = vmul.f32 %v1915_v11, %v672_v2  ;;  %v803_v49 = vmul.f32 %v1957_v20, %v785_v16  ;;  %v804_v2 = vmul.f32 %v1957_v20, %v786_v57 }
 0x20f   : > { %v697_v6 = vmul.f32 %v1915_v11, %v679_v1  ;;  %v851_v11 = vsel %vm2512_vm6, %v840_v51, %v846_v26  ;;  %v904_v26 = vsel %vm902_vm13, %v893_v8, %v899_v23  ;;  %v907_v51 = vsel %vm902_vm13, %v899_v23, %v893_v8  ;;  %v2198_v23 = vpop.permute.xlu0 %995 }
 0x210   : > { %v716_v50 = vpop.permute.xlu1 %715  ;;  %v704_v55 = vadd.f32 %v698_v24, %v656_v59  ;;  %v862_v1 = vsel %vm308_vm3, %v851_v11, 0.0  ;;  %v828_v20 = vmul.f32 %v1987_v30, %v1889_v5  ;;  %v915_v59 = vsel %vm2513_vm9, %v904_v26, 0.0 }
 0x211   : > { %v721_v63 = vsel %vm719_vm15, %v710_v48, %v716_v50  ;;  %v724_v14 = vsel %vm719_vm15, %v716_v50, %v710_v48  ;;  %v703_v54 = vadd.f32 %v697_v6, %v655_v44  ;;  %v863_v6 = vsel %vm309_vm4, %v854_v31, 0.0 }
 0x212   : > { %v732_v53 = vsel %vm2064_vm10, %v724_v14, 0.0  ;;  %v733_v37 = vsel %vm309_vm4, %v721_v63, 0.0  ;;  %v916_v8 = vsel %vm2106_vm1, %v907_v51, 0.0  ;;  %v880_v16 = vmul.f32 %v1995_v34, %v862_v1 }
 0x213   : > { %v750_v56 = vmul.f32 %v1947_v19, %v732_v53  ;;  %v751_v48 = vmul.f32 %v1947_v19, %v733_v37  ;;  %v827_v19 = vmul.f32 %v1987_v30, %v1881_v3  ;;  %v881_v57 = vmul.f32 %v1995_v34, %v863_v6 }
 0x214   : > { %v952_v0 = vpop.permute.xlu1 %951  ;;  %v933_v30 = vmul.f32 %v2001_v36, %v915_v59  ;;  %v934_v14 = vmul.f32 %v2001_v36, %v916_v8 }
 0x215   : > { %v756_v43 = vadd.f32 %v750_v56, %v703_v54  ;;  %v757_v60 = vadd.f32 %v751_v48, %v704_v55  ;;  %v956_v5 = vsel %vm376_vm7, %v2136_v32, %v952_v0  ;;  %v670_v56 = vpop.permute.xlu0 %669 }
 0x216   : > { %v981_v55 = vmul.f32 %v2009_v38, %v956_v5 }
 0x217   : > { %v809_v24 = vadd.f32 %v803_v49, %v756_v43  ;;  %v810_v44 = vadd.f32 %v804_v2, %v757_v60 }
 0x218   : > { %v608_v50 = vpop.permute.xlu1 %607 }
 0x219   : > { %v833_v63 = vadd.f32 %v827_v19, %v809_v24  ;;  %v834_v3 = vadd.f32 %v828_v20, %v810_v44  ;;  %v2212_v49 = vpop.permute.xlu0 %949 }
 0x21b   : > { %v886_v11 = vadd.f32 %v880_v16, %v833_v63  ;;  %v887_v31 = vadd.f32 %v881_v57, %v834_v3 }
 0x21c   : > { %v664_v53 = vpop.permute.xlu1 %663 }
 0x21d   : > { %v939_v37 = vadd.f32 %v933_v30, %v886_v11  ;;  %v2207_v54 = vadd.f32 %v934_v14, %v887_v31  ;;  %v848_v51 = vpop.permute.xlu0 %847  ;;  %v676_v36 = vsel %vm425_vm2, %v670_v56, %v664_v53  ;;  %v673_v60 = vsel %vm425_vm2, %v664_v53, %v670_v56 }
 0x21e   : > { %v681_v1 = vsel %vm1813_vm0, %v676_v36, 0.0  ;;  %v700_v16 = vmul.f32 %v1903_v9, %v673_v60  ;;  %v959_v31 = vsel %vm376_vm7, %v952_v0, %v2136_v32  ;;  %vm1268_vm2 = vcmp.ge.s32.totalorder %v2029_v46, 2 }
 0x21f   : > { %v2210_v34 = vadd.f32 %v981_v55, %v939_v37  ;;  %v699_v47 = vmul.f32 %v1903_v9, %v681_v1 }
 0x220   : > { %v842_v48 = vpop.permute.xlu1 %841 }
 0x221   : > { %v901_v8 = vpop.permute.xlu0 %900  ;;  %v855_v53 = vsel %vm2512_vm6, %v848_v51, %v842_v48 }
 0x222   : > { %v865_v1 = vsel %vm309_vm4, %v855_v53, 0.0 }
 0x224   : > { %v895_v2 = vpop.permute.xlu1 %894 }
 0x225   : > { %v905_v56 = vsel %vm902_vm13, %v895_v2, %v901_v8  ;;  %v908_v32 = vsel %vm902_vm13, %v901_v8, %v895_v2  ;;  %v829_v2 = vmul.f32 %v1979_v28, %v1913_v10  ;;  %vm1003_vm13 = vcmp.lt.s32.totalorder %v1758_v25, 111 }
 0x226   : > { %v883_v8 = vmul.f32 %v1965_v22, %v865_v1 }
 0x228   : > { %v2214_v26 = vpop.permute.xlu1 %947 }
 0x22c   : > { %v614_v43 = vpop.permute.xlu1 %613 }
 0x22d   : > { %v618_v6 = vsel %vm615_vm11, %v608_v50, %v614_v43  ;;  %v621_v19 = vsel %vm615_vm11, %v614_v43, %v608_v50  ;;  %vm2534_vm11 = vcmp.lt.s32.totalorder %v1763_v27, 4 }
 0x22e   : > { %v630_v20 = vsel %vm2038_vm14, %v621_v19, 0.0  ;;  %v631_v24 = vsel %vm307_vm12, %v618_v6, 0.0  ;;  %v830_v6 = vmul.f32 %v1979_v28, %v1935_v15 }
 0x22f   : > { %v651_v44 = vmul.f32 %v1917_v12, %v630_v20  ;;  %v652_v59 = vmul.f32 %v1917_v12, %v631_v24  ;;  %v852_v12 = vsel %vm2512_vm6, %v842_v48, %v848_v51  ;;  %v917_v20 = vsel %vm2513_vm9, %v905_v56, 0.0 }
 0x230   : > { %v718_v57 = vpop.permute.xlu1 %717  ;;  %v864_v62 = vsel %vm308_vm3, %v852_v12, 0.0  ;;  %v918_v24 = vsel %vm2106_vm1, %v908_v32, 0.0  ;;  %v935_v21 = vmul.f32 %v1985_v29, %v917_v20  ;;  %vm2301_vm1 = vmand %vm1774_vm5, %vm309_vm4 }
 0x231   : > { %v657_v63 = vadd.f32 %v651_v44, %v1883_v4  ;;  %v658_v50 = vadd.f32 %v652_v59, %v1883_v4  ;;  %v722_v52 = vsel %vm719_vm15, %v2144_v58, %v718_v57  ;;  %v725_v3 = vsel %vm719_vm15, %v718_v57, %v2144_v58 }
 0x232   : > { %v734_v5 = vsel %vm2064_vm10, %v725_v3, 0.0  ;;  %v735_v9 = vsel %vm309_vm4, %v722_v52, 0.0  ;;  %v882_v59 = vmul.f32 %v1965_v22, %v864_v62  ;;  %v936_v57 = vmul.f32 %v1985_v29, %v918_v24 }
 0x233   : > { %v705_v30 = vadd.f32 %v699_v47, %v657_v63  ;;  %v706_v14 = vadd.f32 %v700_v16, %v658_v50  ;;  %v752_v4 = vmul.f32 %v1939_v17, %v734_v5  ;;  %v753_v11 = vmul.f32 %v1939_v17, %v735_v9  ;;  %v954_v17 = vpop.permute.xlu0 %953 }
 0x234   : > { %v771_v58 = vpop.permute.xlu1 %770  ;;  %v960_v10 = vsel %vm376_vm7, %v954_v17, %v2214_v26  ;;  %v957_v12 = vsel %vm376_vm7, %v2214_v26, %v954_v17  ;;  %vm1267_vm15 = vcmp.ge.s32.totalorder %v2026_v45, 2 }
 0x235   : > { %v775_v37 = vsel %vm772_vm8, %v2172_v7, %v771_v58  ;;  %v778_v55 = vsel %vm772_vm8, %v771_v58, %v2172_v7  ;;  %v758_v51 = vadd.f32 %v752_v4, %v705_v30  ;;  %v759_v36 = vadd.f32 %v753_v11, %v706_v14 }
 0x236   : > { %v787_v0 = vsel %vm2513_vm9, %v778_v55, 0.0  ;;  %v788_v48 = vsel %vm307_vm12, %v775_v37, 0.0  ;;  %v964_v7 = vsel %vm1774_vm5, %v959_v31, 0.0  ;;  %v966_v5 = vsel %vm1774_vm5, %v960_v10, 0.0 }
 0x237   : > { %v805_v43 = vmul.f32 %v1945_v18, %v787_v0  ;;  %v806_v60 = vmul.f32 %v1945_v18, %v788_v48  ;;  %v982_v47 = vmul.f32 %v2009_v38, %v964_v7  ;;  %v1000_v16 = vpop.permute.xlu0 %999  ;;  %v983_v37 = vmul.f32 %v1999_v35, %v957_v12 }
 0x238   : > { %v944_v19 = vpop.permute.xlu1 %943  ;;  %v984_v55 = vmul.f32 %v1999_v35, %v966_v5 }
 0x239   : > { %v811_v18 = vadd.f32 %v805_v43, %v758_v51  ;;  %v812_v44 = vadd.f32 %v806_v60, %v759_v36  ;;  %v958_v63 = vsel %vm376_vm7, %v2212_v49, %v944_v19  ;;  %v955_v3 = vsel %vm376_vm7, %v944_v19, %v2212_v49 }
 0x23a   : > { %v962_v14 = vsel %vm1774_vm5, %v958_v63, 0.0  ;;  %v988_v26 = vadd.f32 %v982_v47, %v2207_v54  ;;  %v979_v31 = vmul.f32 %v2021_v41, %v955_v3  ;;  %vm1104_vm5 = vcmp.lt.s32.totalorder %v2026_v45, 14 }
 0x23b   : > { %v835_v15 = vadd.f32 %v829_v2, %v811_v18  ;;  %v836_v28 = vadd.f32 %v830_v6, %v812_v44  ;;  %v980_v56 = vmul.f32 %v2021_v41, %v962_v14  ;;  %v998_v51 = vpop.permute.xlu0 %997  ;;  %vm1105_vm7 = vcmp.lt.s32.totalorder %v2029_v46, 14  ;;  %vm2393_vm14 = vmand %vm2534_vm11, %vm1104_vm5 }
 0x23c   : > { %v994_v50 = vpop.permute.xlu1 %993  ;;  %v985_v41 = vadd.f32 %v979_v31, %v2130_v61 }
 0x23d   : > { %v888_v52 = vadd.f32 %v882_v59, %v835_v15  ;;  %v889_v38 = vadd.f32 %v883_v8, %v836_v28  ;;  %v1005_v29 = vsel %vm1003_vm13, %v994_v50, %v1000_v16  ;;  %v1008_v9 = vsel %vm1003_vm13, %v1000_v16, %v994_v50 }
 0x23e   : > { %v1016_v30 = vsel %vm308_vm3, %v1005_v29, 0.0  ;;  %v1017_v49 = vsel %vm2301_vm1, %v1008_v9, 0.0  ;;  %v986_v24 = vadd.f32 %v980_v56, %v2128_v13 }
 0x23f   : > { %v1034_v4 = vmul.f32 %v2015_v40, %v1016_v30  ;;  %v941_v11 = vadd.f32 %v935_v21, %v888_v52  ;;  %v1035_v58 = vmul.f32 %v2015_v40, %v1017_v49  ;;  %v942_v62 = vadd.f32 %v936_v57, %v889_v38 }
 0x240   : > { %v1002_v53 = vpop.permute.xlu1 %1001 }
 0x241   : > { %v2330_v33 = vadd.f32 %v1034_v4, %v2210_v34  ;;  %v1006_v17 = vsel %vm1003_vm13, %v2198_v23, %v1002_v53  ;;  %v2336_v54 = vadd.f32 %v1035_v58, %v988_v26  ;;  %v1009_v40 = vsel %vm1003_vm13, %v1002_v53, %v2198_v23 }
 0x242   : > { %v1018_v32 = vsel %vm308_vm3, %v1006_v17, 0.0  ;;  %v989_v34 = vadd.f32 %v983_v37, %v941_v11  ;;  %v1019_v0 = vsel %vm2301_vm1, %v1009_v40, 0.0  ;;  %v990_v43 = vadd.f32 %v984_v55, %v942_v62 }
 0x243   : > { %v1046_v35 = vmul.f32 %v2330_v33, %v2330_v33  ;;  %v1036_v48 = vmul.f32 %v2013_v39, %v1018_v32  ;;  %v1047_v36 = vmul.f32 %v2336_v54, %v2336_v54  ;;  %v1037_v23 = vmul.f32 %v2013_v39, %v1019_v0 }
 0x244   : > { %v992_v60 = vpop.permute.xlu1 %991 }
 0x245   : > { %v1052_v7 = vmul.f32 %v1046_v35, %v2330_v33  ;;  %v2353_v1 = vadd.f32 %v1036_v48, %v989_v34  ;;  %v1004_v2 = vsel %vm1003_vm13, %v992_v60, %v998_v51  ;;  %v1007_v6 = vsel %vm1003_vm13, %v998_v51, %v992_v60 }
 0x246   : > { %v2359_v19 = vadd.f32 %v1037_v23, %v990_v43  ;;  %v1014_v61 = vsel %vm308_vm3, %v1004_v2, 0.0  ;;  %v1015_v20 = vsel %vm2301_vm1, %v1007_v6, 0.0  ;;  %v1053_v39 = vmul.f32 %v1047_v36, %v2336_v54  ;;  %vm2537_vm3 = vmmov %vm2534_vm11 }
 0x247   : > { %v1048_v18 = vmul.f32 %v2353_v1, %v2353_v1  ;;  %v1032_v44 = vmul.f32 %v2023_v42, %v1014_v61  ;;  %v1033_v59 = vmul.f32 %v2023_v42, %v1015_v20  ;;  %v1058_v8 = vmul.f32 0.044715, %v1052_v7  ;;  %vm2400_vm4 = vmand %vm2537_vm3, %vm1105_vm7 }
 0x248   : > { %v1049_v10 = vmul.f32 %v2359_v19, %v2359_v19  ;;  %v1059_v15 = vmul.f32 0.044715, %v1053_v39  ;;  %v1098_v39 = vadd.s32 16, %v1763_v27  ;;  %vm1134_vm13 = vcmp.lt.s32.totalorder %v1758_v25, 126 }
 0x249   : > { %v1054_v28 = vmul.f32 %v1048_v18, %v2353_v1  ;;  %v1038_v47 = vadd.f32 %v1032_v44, %v985_v41  ;;  %v1039_v16 = vadd.f32 %v1033_v59, %v986_v24  ;;  %v1064_v22 = vadd.f32 %v1058_v8, %v2330_v33  ;;  %v2540_v44 = vld [vmem:[#allocation4_spill] sm:$0xff] }
 0x24a   : > { %v1055_v21 = vmul.f32 %v1049_v10, %v2359_v19  ;;  %v1065_v63 = vadd.f32 %v1059_v15, %v2336_v54  ;;  %vm1263_vm0 = vcmp.lt.s32.totalorder %v1098_v39, 20  ;;  %vm1214_vm10 = vcmp.ge.s32.totalorder %v2540_v44, 12 }
 0x24b   : > { %v1044_v57 = vmul.f32 %v1038_v47, %v1038_v47  ;;  %v1045_v13 = vmul.f32 %v1039_v16, %v1039_v16  ;;  %v1060_v50 = vmul.f32 0.044715, %v1054_v28  ;;  %v1070_v30 = vmul.f32 0.7978846, %v1064_v22  ;;  %vm2407_vm6 = vmand %vm1263_vm0, %vm1268_vm2 }
 0x24c   : > { %v1061_v52 = vmul.f32 0.044715, %v1055_v21  ;;  %v1071_v12 = vmul.f32 0.7978846, %v1065_v63  ;;  %vm1297_vm1 = vcmp.lt.s32.totalorder %v1758_v25, 2  ;;  %vm2411_vm5 = vmand %vm1263_vm0, %vm1267_vm15  ;;  %vm1153_vm7 = vcmp.lt.s32.totalorder %v2029_v46, 15 }
 0x24d   : > { %v1051_v42 = vmul.f32 %v1045_v13, %v1039_v16  ;;  %v1050_v38 = vmul.f32 %v1044_v57, %v1038_v47  ;;  %v1066_v9 = vadd.f32 %v1060_v50, %v2353_v1  ;;  %vm1319_vm11 = vcmask 1043456   ;;  %vm2421_vm9 = vmand %vm1214_vm10, %vm307_vm12 }
 0x24e   : > { %v1067_v5 = vadd.f32 %v1061_v52, %v2359_v19  ;;  %1590 = vtanh.f32 %v1071_v12  ;;  %vm1196_vm3 = vcmp.lt.s32.totalorder %v2540_v44, 12  ;;  %vm1152_vm2 = vcmp.lt.s32.totalorder %v2026_v45, 15 }
 0x24f   : > { %v1057_v3 = vmul.f32 0.044715, %v1051_v42  ;;  %v1056_v29 = vmul.f32 0.044715, %v1050_v38  ;;  %1592 = vtanh.f32 %v1070_v30  ;;  %v1072_v31 = vmul.f32 0.7978846, %v1066_v9 }
 0x250   : > { %v1073_v26 = vmul.f32 0.7978846, %v1067_v5  ;;  %vm2547_vm0 = vcmp.ge.s32.totalorder %v2026_v45, 1  ;;  %vm2550_vm12 = vcmp.ge.s32.totalorder %v1763_v27, 4 }
 0x251   : > { %v1063_v14 = vadd.f32 %v1057_v3, %v1039_v16  ;;  %v1062_v49 = vadd.f32 %v1056_v29, %v1038_v47  ;;  %vm2434_vm15 = vmand %vm1214_vm10, %vm2547_vm0 }
 0x252   : > { %vm2450_vm10 = vmand %vm2550_vm12, %vm1153_vm7 }
 0x253   : > { %v1069_v4 = vmul.f32 0.7978846, %v1063_v14  ;;  %v1068_v11 = vmul.f32 0.7978846, %v1062_v49 }
 0x255   : > { %1594 = vtanh.f32 %v1069_v4  ;;  %v1310_v4 = vld [vmem:[%s2505_s4] sm:$0xff] }
 0x256   : > { %1596 = vtanh.f32 %v1068_v11  ;;  %v1311_v11 = vld [vmem:[%s2505_s4 + $0x8] sm:$0x3] }
 0x257   : > { %1598 = vtanh.f32 %v1073_v26 }
 0x258   : > { %1600 = vtanh.f32 %v1072_v31 }
 0x25b   : > { %v1591_v58 = vpop.eup %1590 }
 0x25c   : > { %v1593_v53 = vpop.eup %1592  ;;  %v1083_v17 = vadd.f32 1.0, %v1591_v58 }
 0x25d   : > { %v1082_v32 = vadd.f32 1.0, %v1593_v53 }
 0x25e   : > { %v1089_v51 = vmul.f32 0.5, %v1083_v17 }
 0x25f   : > { %v1088_v43 = vmul.f32 0.5, %v1082_v32 }
 0x260   : > { %v1095_v60 = vmul.f32 %v1089_v51, %v2336_v54 }
 0x261   : > { %v1094_v2 = vmul.f32 %v1088_v43, %v2330_v33 }
 0x262   : > { %v1595_v62 = vpop.eup %1594  ;;  %v1210_v38 = vsel %vm1196_vm3, %v1095_v60, 0.0 }
 0x263   : > { %v1597_v37 = vpop.eup %1596  ;;  %v1081_v55 = vadd.f32 1.0, %v1595_v62  ;;  %v1209_v12 = vsel %vm1196_vm3, %v1094_v2, 0.0 }
 0x264   : > { %v1599_v56 = vpop.eup %1598  ;;  %v1080_v40 = vadd.f32 1.0, %v1597_v37 }
 0x265   : > { %v1601_v35 = vpop.eup %1600  ;;  %v1087_v34 = vmul.f32 0.5, %v1081_v55  ;;  %v1085_v41 = vadd.f32 1.0, %v1599_v56 }
 0x266   : > { %v1086_v0 = vmul.f32 0.5, %v1080_v40  ;;  %v1084_v23 = vadd.f32 1.0, %v1601_v35 }
 0x267   : > { %v1093_v48 = vmul.f32 %v1087_v34, %v1039_v16  ;;  %v1091_v7 = vmul.f32 0.5, %v1085_v41 }
 0x268   : > { %v1092_v36 = vmul.f32 %v1086_v0, %v1038_v47  ;;  %v1090_v6 = vmul.f32 0.5, %v1084_v23 }
 0x269   : > { %1128 = vrot.lane.b32.xlu0 %v1093_v48, %s1646_s12  ;;  %v1097_v61 = vmul.f32 %v1091_v7, %v2359_v19 }
 0x26a   : > { %1122 = vrot.lane.b32.xlu1 %v1092_v36, %s1646_s12  ;;  %v1096_v20 = vmul.f32 %v1090_v6, %v2353_v1 }
 0x26d   : > { %1242 = vrot.lane.b32.xlu0 %v1095_v60, %s1642_s24 }
 0x26e   : > { %1236 = vrot.lane.b32.xlu1 %v1094_v2, %s1642_s24 }
 0x271   : > { %1295 = vrot.lane.b32.xlu0 %v1097_v61, %s1647_s15 }
 0x272   : > { %1289 = vrot.lane.b32.xlu1 %v1096_v20, %s1647_s15 }
 0x275   : > { %1176 = vrot.lane.b32.xlu0 %v1093_v48, %s1643_s27 }
 0x276   : > { %1170 = vrot.lane.b32.xlu1 %v1092_v36, %s1643_s27 }
 0x2db   : > { %v1129_v54 = vpop.permute.xlu0 %1128 }
 0x2dc   : > { %v1123_v33 = vpop.permute.xlu1 %1122 }
 0x2dd   : > { %v1135_v47 = vsel %vm1134_vm13, %v1123_v33, %v1129_v54  ;;  %v1138_v63 = vsel %vm1134_vm13, %v1129_v54, %v1123_v33  ;;  %vm2554_vm13 = vcmp.lt.s32.totalorder %v1758_v25, 127  ;;  %v2556_v25 = vmov 0.0  }
 0x2de   : > { %v1141_v3 = vsel %vm2393_vm14, %v1135_v47, 0.0  ;;  %v1142_v5 = vsel %vm2400_vm4, %v1138_v63, 0.0 }
 0x2df   : > { %v1243_v24 = vpop.permute.xlu0 %1242 }
 0x2e0   : > { %v1237_v19 = vpop.permute.xlu1 %1236 }
 0x2e1   : > { %v1247_v16 = vsel %vm772_vm8, %v1237_v19, %v1243_v24  ;;  %v1250_v22 = vsel %vm772_vm8, %v1243_v24, %v1237_v19  ;;  %vm2553_vm8 = vmmov %vm2550_vm12 }
 0x2e2   : > { %v1255_v29 = vsel %vm2421_vm9, %v1247_v16, %v1210_v38  ;;  %v1254_v30 = vsel %vm2434_vm15, %v1250_v22, %v1209_v12  ;;  %vm1312_vm9 = vcmask 162816  }
 0x2e3   : > { %v1296_v8 = vpop.permute.xlu0 %1295 }
 0x2e4   : > { %v1290_v15 = vpop.permute.xlu1 %1289 }
 0x2e5   : > { %v1303_v21 = vsel %vm1297_vm1, %v1296_v8, %v1290_v15  ;;  %v1300_v57 = vsel %vm1297_vm1, %v1290_v15, %v1296_v8  ;;  %vm2555_vm1 = vmmov %vm2554_vm13 }
 0x2e6   : > { %v1309_v50 = vsel %vm2407_vm6, %v1300_v57, 0.0  ;;  %v1308_v52 = vsel %vm2411_vm5, %v1303_v21, 0.0  ;;  %vm1164_vm6 = vmand %vm2553_vm8, %vm1152_vm2 }
 0x2e7   : > { %1511 = vmatprep.subr.msk.mxu1 %vm1319_vm11, %v1309_v50  ;;  %v1177_v42 = vpop.permute.xlu0 %1176 }
 0x2e8   : > { %1512 = vmatpush1.msk.msra.mxu1 %vm1319_vm11, %v1308_v52  ;;  %v1171_v46 = vpop.permute.xlu1 %1170 }
 0x2e9   : > { %v1182_v9 = vsel %vm2554_vm13, %v1171_v46, %v1177_v42  ;;  %v1185_v27 = vsel %vm2555_vm1, %v1177_v42, %v1171_v46  ;;  %1354 = vmatprep.subr.mxu1 %v1255_v29 }
 0x2ea   : > { %1355 = vmatpush1.msra.mxu1 %v1254_v30  ;;  %v1189_v14 = vsel %vm2450_vm10, %v1185_v27, %v1142_v5  ;;  %v1188_v49 = vsel %vm1164_vm6, %v1182_v9, %v1141_v3 }
 0x2eb   : > { %1356 = vmatprep.subr.mxu1 %v1189_v14 }
 0x2ec   : > { %1357 = vmatpush1.msra.mxu1 %v1188_v49 }
 0x2ed   : > { %1513 = vmatmul.mubr.msk.f32.vlgmr.msra.gmra.mxu1 %vm1312_vm9, %v1310_v4 }
 0x2ee   : > { %1396 = vmatprep.mubr.f32.mxu1 %v2556_v25 }
 0x2f1   : > { %1514 = vmatmul.mubr.msk.f32.gmra.mxu1 %vm1312_vm9, %v1311_v11 }
 0x3ad   : > { %v1392_v26 = vpop.f32.mrf.mxu1 }
 0x3ae   : > { %1403 = vst [vmem:[%s244_s9] sm:$0xff] %v1392_v26 }
 0x3af   : > { %v1394_v31 = vpop.f32.mrf.mxu1 }
 0x3b0   : > { %1404 = vst [vmem:[%s244_s9 + $0x8] sm:$0xff] %v1394_v31  ;;  %1413 = sbr.rel (!%p1708_p5) target bundleno = 957 (0x3bd), region = 67 }
 0x3b1   : > { %v1398_v58 = vpop.f32.mrf.mxu1 }
 0x3b2   : > { %1405 = vst [vmem:[%s244_s9 + $0x10] sm:$0x3] %v1398_v58 }
 0x3b3   : > { %v1400_v53 = vpop.f32.mrf.mxu1 }
 0x3b4   : > { %1406 = vst [vmem:[%s244_s9 + $0x18] sm:$0x3] %v1400_v53 }
 0x3b5   : > { %v1429_v62 = vld [vmem:[%s244_s9] sm:$0xff] }
 0x3b6   : > { %1430 = vst [vmem:[%s1416_s10] sm:$0xff] %v1429_v62 }
 0x3b7   : > { %v1431_v37 = vld [vmem:[%s244_s9 + $0x8] sm:$0xff] }
 0x3b8   : > { %1432 = vst [vmem:[%s1416_s10 + $0x8] sm:$0xff] %v1431_v37 }
 0x3b9   : > { %v1433_v55 = vld [vmem:[%s244_s9 + $0x10] sm:$0xff] }
 0x3ba   : > { %1434 = vst [vmem:[%s1416_s10 + $0x20] sm:$0xff] %v1433_v55 }
 0x3bb   : > { %v1435_v17 = vld [vmem:[%s244_s9 + $0x18] sm:$0xff] }
 0x3bc   : > { %1436 = vst [vmem:[%s1416_s10 + $0x28] sm:$0xff] %v1435_v17 }
 0x3bd PF: > { %p12_p10 = scmp.ge.s32.totalorder %s1695_s22, 4   ;;  %s2557_s18 = smov %s1620_s19 }
 0x3be   : > { %s2558_s19 = smov %s1706_s25  ;;  %s2559_s20 = smov %s1695_s22 }
 0x3bf   :  { %14 = sbr.rel (!%p12_p10) target bundleno = 2 (0x2), region = 121 }

</bundles_post_ra>
